<compile_context>
chip_gen: v7x
topology: tpu7x:2x2x1
jax: 0.10.0
libtpu: 0.0.40
codegen_flags: <defaults>
</compile_context>

<pallas_src>
import jax
import jax.numpy as jnp
from jax import lax
from jax.experimental import pallas as pl
from jax.experimental.pallas import tpu as pltpu

# ----- hyper-parameters matching the PyTorch module ------------------------
D_MODEL = 1          # input_dim
NHEAD = 1            # num_heads
NUM_LAYERS = 100     # num_encoder_layers == num_decoder_layers
D_FF = 2048          # nn.Transformer default dim_feedforward
LN_EPS = 1e-5        # nn.Transformer default layer_norm_eps

F_CHUNK = 512                     # lanes per FF chunk (bounds live vregs)
N_CHUNKS = D_FF // F_CHUNK        # 4
FF_ROWS = NUM_LAYERS * N_CHUNKS   # 400 rows in the packed (3, 400, 512) weight slab


# ---------------------------------------------------------------------------
# In-kernel math helpers (VPU / XLU / EUP only; activations carry the size-1
# feature dim squeezed, i.e. shape (batch, seq) with seq on lanes)
# ---------------------------------------------------------------------------
def _ln_feat1(v, g, b):
    """LayerNorm over the feature dim (size d_model == 1), applied elementwise.

    With one feature: mean == v and var == 0, so the general formula
    (v - mean) * rsqrt(var + eps) * gamma + beta is evaluated with centered == 0.
    """
    c = v - v            # centered value (exactly zero for a size-1 feature dim)
    var = c * c
    return c * lax.rsqrt(var + LN_EPS) * g + b


def _attn_e1(q_src, kv_src, wq, bq, wk, bk, wv, bv, wo, bo):
    """Single-head attention with embed_dim == head_dim == 1.

    q_src: (B, Lq), kv_src: (B, Lk).  All projections are scalar multiply-adds,
    scores are an outer-product broadcast, softmax reduces over lanes.
    scale = 1/sqrt(head_dim) = 1.
    """
    q = q_src * wq + bq
    k = kv_src * wk + bk
    v = kv_src * wv + bv
    s = q[:, :, None] * k[:, None, :]                  # (B, Lq, Lk)
    s = s - jnp.max(s, axis=-1, keepdims=True)
    p = jnp.exp(s)
    p = p / jnp.sum(p, axis=-1, keepdims=True)
    ctx = jnp.sum(p * v[:, None, :], axis=-1)          # (B, Lq)
    return ctx * wo + bo


def _ffn_e1(x, ff_ref, l, b2):
    """Position-wise FFN for d_model == 1: relu(x*w1 + b1) . w2 + b2.

    ff_ref: (3, FF_ROWS, F_CHUNK) VMEM slab (planes: w1, b1, w2); layer l's
    hidden units live in rows [l*N_CHUNKS, (l+1)*N_CHUNKS).  Chunking keeps the
    live working set small (h is (B,S,512) per chunk instead of (B,S,2048)).
    """
    B, S = x.shape
    xc = x[:, :, None]                                 # (B, S, 1)

    def chunk(c, acc):
        row = l * N_CHUNKS + c
        w1 = ff_ref[0, pl.ds(row, 1), :]               # (1, F_CHUNK) lane-dense
        b1 = ff_ref[1, pl.ds(row, 1), :]
        w2 = ff_ref[2, pl.ds(row, 1), :]
        h = jnp.maximum(xc * w1[None, :, :] + b1[None, :, :], 0.0)   # (B, S, FC)
        return acc + jnp.sum(h * w2[None, :, :], axis=-1)            # (B, S)

    acc0 = jnp.zeros((B, S), jnp.float32)
    return lax.fori_loop(0, N_CHUNKS, chunk, acc0, unroll=True) + b2


# ---------------------------------------------------------------------------
# Single fused kernel: encoder stack -> decoder stack -> head, all in one call
# ---------------------------------------------------------------------------
def _transformer_kernel(esc_ref, efin_ref, dsc_ref, dfin_ref,
                        x_ref, enc_ff_ref, dec_ff_ref, out_ref):
    x0 = x_ref[...]                                    # (B, S) float32

    # --------------------------- encoder stack ----------------------------
    def enc_layer(l, x):
        wq, wk, wv = esc_ref[0, l], esc_ref[1, l], esc_ref[2, l]
        bq, bk, bv = esc_ref[3, l], esc_ref[4, l], esc_ref[5, l]
        wo, bo = esc_ref[6, l], esc_ref[7, l]
        b2 = esc_ref[8, l]
        g1, be1 = esc_ref[9, l], esc_ref[10, l]
        g2, be2 = esc_ref[11, l], esc_ref[12, l]

        sa = _attn_e1(x, x, wq, bq, wk, bk, wv, bv, wo, bo)
        x2 = _ln_feat1(x + sa, g1, be1)
        ff = _ffn_e1(x2, enc_ff_ref, l, b2)
        return _ln_feat1(x2 + ff, g2, be2)

    mem = lax.fori_loop(0, NUM_LAYERS, enc_layer, x0)
    # final TransformerEncoder norm (done exactly once)
    mem = _ln_feat1(mem, efin_ref[0], efin_ref[1])

    # --------------------------- decoder stack ----------------------------
    def dec_layer(l, y):
        swq, swk, swv = dsc_ref[0, l], dsc_ref[1, l], dsc_ref[2, l]
        sbq, sbk, sbv = dsc_ref[3, l], dsc_ref[4, l], dsc_ref[5, l]
        swo, sbo = dsc_ref[6, l], dsc_ref[7, l]
        cwq, cwk, cwv = dsc_ref[8, l], dsc_ref[9, l], dsc_ref[10, l]
        cbq, cbk, cbv = dsc_ref[11, l], dsc_ref[12, l], dsc_ref[13, l]
        cwo, cbo = dsc_ref[14, l], dsc_ref[15, l]
        b2 = dsc_ref[16, l]
        g1, be1 = dsc_ref[17, l], dsc_ref[18, l]
        g2, be2 = dsc_ref[19, l], dsc_ref[20, l]
        g3, be3 = dsc_ref[21, l], dsc_ref[22, l]

        # no masks, matching nn.Transformer(src, src) called without masks
        sa = _attn_e1(y, y, swq, sbq, swk, sbk, swv, sbv, swo, sbo)
        y2 = _ln_feat1(y + sa, g1, be1)
        ca = _attn_e1(y2, mem, cwq, cbq, cwk, cbk, cwv, cbv, cwo, cbo)
        y3 = _ln_feat1(y2 + ca, g2, be2)
        ff = _ffn_e1(y3, dec_ff_ref, l, b2)
        return _ln_feat1(y3 + ff, g3, be3)

    y = lax.fori_loop(0, NUM_LAYERS, dec_layer, x0)

    # final TransformerDecoder norm, last sequence position, Linear(1,1) head
    # (written exactly once -> single masked (B,1) store).
    z = _ln_feat1(y, dfin_ref[0], dfin_ref[1])         # (B, S)
    out_ref[...] = z[:, -1:] * dfin_ref[2] + dfin_ref[3]   # (B, 1)


# ---------------------------------------------------------------------------
# pallas_call wrapper: one launch, whole parameter set VMEM/SMEM-resident
# ---------------------------------------------------------------------------
def transformer_forward(packed, src):
    """src: (batch, seq, d_model=1)  ->  (batch, 1).

    PyTorch's permute(1,0,2) only relabels axes; with the size-1 feature dim
    squeezed we keep activations as (batch, seq) with seq on lanes, and
    output[-1, :, :] becomes the last lane of the decoder activation.
    """
    x = src[:, :, 0].astype(jnp.float32)               # (B, S)
    B, S = x.shape

    act_spec = pl.BlockSpec((B, S), lambda i, *_: (0, 0))
    ff_spec = pl.BlockSpec((3, FF_ROWS, F_CHUNK), lambda i, *_: (0, 0, 0))
    out_spec = pl.BlockSpec((B, 1), lambda i, *_: (0, 0))

    return pl.pallas_call(
        _transformer_kernel,
        out_shape=jax.ShapeDtypeStruct((B, 1), jnp.float32),
        grid_spec=pltpu.PrefetchScalarGridSpec(
            # enc_sc (13,L), enc_fin (2,), dec_sc (23,L), dec_fin (4,) -> SMEM
            num_scalar_prefetch=4,
            grid=(1,),
            in_specs=[act_spec, ff_spec, ff_spec],
            out_specs=out_spec,
        ),
        compiler_params=pltpu.CompilerParams(
            dimension_semantics=("arbitrary",),
            vmem_limit_bytes=32 * 1024 * 1024,   # safe on v5e/v6e/v7x; ~10 MB used
        ),
    )(packed["enc_sc"], packed["enc_fin"], packed["dec_sc"], packed["dec_fin"],
      x, packed["enc_ff"], packed["dec_ff"])


# ---------------------------------------------------------------------------
# Parameters: synthetic init in nn.Transformer shapes, then packed ONCE into
# the kernel layout (dense lane-major FF slabs, SMEM scalar tables).
# ---------------------------------------------------------------------------
def init_params(key):
    E, F, L = D_MODEL, D_FF, NUM_LAYERS
    keys = iter(jax.random.split(key, 64))

    def n(shape, scale=0.05):
        return scale * jax.random.normal(next(keys), shape, jnp.float32)

    def ln(shape):
        return 1.0 + n(shape, 0.02), n(shape, 0.02)     # gamma, beta

    enc = dict(
        sa_in_w=n((L, 3 * E, E)), sa_in_b=n((L, 3 * E)),
        sa_out_w=n((L, E, E)), sa_out_b=n((L, E)),
        ff1_w=n((L, F, E)), ff1_b=n((L, F)),
        ff2_w=n((L, E, F)), ff2_b=n((L, E)),
    )
    enc["n1_g"], enc["n1_b"] = ln((L, E))
    enc["n2_g"], enc["n2_b"] = ln((L, E))

    dec = dict(
        sa_in_w=n((L, 3 * E, E)), sa_in_b=n((L, 3 * E)),
        sa_out_w=n((L, E, E)), sa_out_b=n((L, E)),
        ca_in_w=n((L, 3 * E, E)), ca_in_b=n((L, 3 * E)),
        ca_out_w=n((L, E, E)), ca_out_b=n((L, E)),
        ff1_w=n((L, F, E)), ff1_b=n((L, F)),
        ff2_w=n((L, E, F)), ff2_b=n((L, E)),
    )
    dec["n1_g"], dec["n1_b"] = ln((L, E))
    dec["n2_g"], dec["n2_b"] = ln((L, E))
    dec["n3_g"], dec["n3_b"] = ln((L, E))

    enc_norm_g, enc_norm_b = ln((E,))
    dec_norm_g, dec_norm_b = ln((E,))

    return dict(enc=enc, dec=dec,
                enc_norm_g=enc_norm_g, enc_norm_b=enc_norm_b,
                dec_norm_g=dec_norm_g, dec_norm_b=dec_norm_b,
                head_w=n((1, E)), head_b=n((1,)))


def pack_params(raw):
    """One-time re-layout of the PyTorch-shaped weights into the kernel layout."""
    E, F, L = D_MODEL, D_FF, NUM_LAYERS
    enc, dec = raw["enc"], raw["dec"]

    def v(a):                               # -> (L,)
        return a.reshape(L)

    def attn_rows(in_w, in_b, out_w, out_b):
        # torch in_proj packs rows [q; k; v] of shape (3E, E) with E = 1.
        return [v(in_w[:, 0, 0]), v(in_w[:, 1, 0]), v(in_w[:, 2, 0]),
                v(in_b[:, 0]), v(in_b[:, 1]), v(in_b[:, 2]),
                v(out_w), v(out_b)]

    enc_sc = jnp.stack(
        attn_rows(enc["sa_in_w"], enc["sa_in_b"], enc["sa_out_w"], enc["sa_out_b"])
        + [v(enc["ff2_b"]),
           v(enc["n1_g"]), v(enc["n1_b"]), v(enc["n2_g"]), v(enc["n2_b"])],
        axis=0)                                                    # (13, L)

    dec_sc = jnp.stack(
        attn_rows(dec["sa_in_w"], dec["sa_in_b"], dec["sa_out_w"], dec["sa_out_b"])
        + attn_rows(dec["ca_in_w"], dec["ca_in_b"], dec["ca_out_w"], dec["ca_out_b"])
        + [v(dec["ff2_b"]),
           v(dec["n1_g"]), v(dec["n1_b"]), v(dec["n2_g"]), v(dec["n2_b"]),
           v(dec["n3_g"]), v(dec["n3_b"])],
        axis=0)                                                    # (23, L)

    def ff_pack(layer):
        # linear1.weight (L,F,1), linear1.bias (L,F), linear2.weight (L,1,F)
        # -> one dense lane-major slab (3, L*N_CHUNKS, F_CHUNK): no sublane padding,
        # layer l / chunk c lives at row l*N_CHUNKS + c.
        def rows(a):
            return a.reshape(L, F).reshape(FF_ROWS, F_CHUNK)
        return jnp.stack([rows(layer["ff1_w"]),
                          rows(layer["ff1_b"]),
                          rows(layer["ff2_w"])], axis=0)           # (3, 400, 512)

    enc_fin = jnp.concatenate([raw["enc_norm_g"].reshape(1),
                               raw["enc_norm_b"].reshape(1)])               # (2,)
    dec_fin = jnp.concatenate([raw["dec_norm_g"].reshape(1),
                               raw["dec_norm_b"].reshape(1),
                               raw["head_w"].reshape(1),
                               raw["head_b"].reshape(1)])                   # (4,)

    return dict(enc_sc=enc_sc, enc_fin=enc_fin, enc_ff=ff_pack(enc),
                dec_sc=dec_sc, dec_fin=dec_fin, dec_ff=ff_pack(dec))


if __name__ == "__main__":
    key = jax.random.PRNGKey(0)
    pkey, xkey = jax.random.split(key)
    raw = init_params(pkey)
    packed = pack_params(raw)

    batch, seq = 2, 8
    src = jax.random.normal(xkey, (batch, seq, D_MODEL), jnp.float32)

    fwd = jax.jit(transformer_forward)
    y = fwd(packed, src)
    jax.block_until_ready(y)
    assert y.shape == (batch, 1) and y.dtype == jnp.float32

    # Exact identity of the reference model at d_model=1: every LayerNorm over a
    # single feature returns its beta, so the output equals
    # dec_norm.beta * head_w + head_b for every batch row.
    expected = raw["dec_norm_b"][0] * raw["head_w"][0, 0] + raw["head_b"][0]
    assert jnp.allclose(y, expected, atol=1e-5)

    print("KERNEL_OK")
</pallas_src>

<mosaic_0001>
module attributes {stable_mosaic.version = 11 : i64} {
  func.func @_transformer_kernel(%arg0: i32, %arg1: memref<13x100xf32, #tpu.memory_space<smem>>, %arg2: memref<2xf32, #tpu.memory_space<smem>>, %arg3: memref<23x100xf32, #tpu.memory_space<smem>>, %arg4: memref<4xf32, #tpu.memory_space<smem>>, %arg5: memref<2x8xf32, #tpu.memory_space<vmem>>, %arg6: memref<3x400x512xf32, #tpu.memory_space<vmem>>, %arg7: memref<3x400x512xf32, #tpu.memory_space<vmem>>, %arg8: memref<2x1xf32, #tpu.memory_space<vmem>>) attributes {dimension_semantics = [#tpu.dimension_semantics<arbitrary>], iteration_bounds = array<i64: 1>, scalar_prefetch = 4 : i64, scratch_operands = 0 : i64, tpu.core_type = #tpu.core_type<tc>, window_params = [{pipeline_mode = #tpu.pipeline_mode<synchronous>, transform_indices = @transform_0, window_bounds = array<i64: 2, 8>}, {pipeline_mode = #tpu.pipeline_mode<synchronous>, transform_indices = @transform_1, window_bounds = array<i64: 3, 400, 512>}, {pipeline_mode = #tpu.pipeline_mode<synchronous>, transform_indices = @transform_2, window_bounds = array<i64: 3, 400, 512>}, {pipeline_mode = #tpu.pipeline_mode<synchronous>, transform_indices = @transform_3, window_bounds = array<i64: 2, 1>}]} {
    %c0 = arith.constant 0 : index
    %c0_0 = arith.constant 0 : index
    %0 = vector.load %arg5[%c0, %c0_0] : memref<2x8xf32, #tpu.memory_space<vmem>>, vector<2x8xf32>
    %c0_i32 = arith.constant 0 : i32
    %c100_i32 = arith.constant 100 : i32
    %1 = arith.addi %c0_i32, %c100_i32 : i32
    %c1_i32 = arith.constant 1 : i32
    %2 = scf.for %arg9 = %c0_i32 to %1 step %c1_i32 iter_args(%arg10 = %0) -> (vector<2x8xf32>)  : i32 {
      %c0_12 = arith.constant 0 : index
      %37 = arith.index_cast %arg9 : i32 to index
      %38 = memref.load %arg1[%c0_12, %37] : memref<13x100xf32, #tpu.memory_space<smem>>
      %c1_13 = arith.constant 1 : index
      %39 = arith.index_cast %arg9 : i32 to index
      %40 = memref.load %arg1[%c1_13, %39] : memref<13x100xf32, #tpu.memory_space<smem>>
      %c2_14 = arith.constant 2 : index
      %41 = arith.index_cast %arg9 : i32 to index
      %42 = memref.load %arg1[%c2_14, %41] : memref<13x100xf32, #tpu.memory_space<smem>>
      %c3_15 = arith.constant 3 : index
      %43 = arith.index_cast %arg9 : i32 to index
      %44 = memref.load %arg1[%c3_15, %43] : memref<13x100xf32, #tpu.memory_space<smem>>
      %c4 = arith.constant 4 : index
      %45 = arith.index_cast %arg9 : i32 to index
      %46 = memref.load %arg1[%c4, %45] : memref<13x100xf32, #tpu.memory_space<smem>>
      %c5 = arith.constant 5 : index
      %47 = arith.index_cast %arg9 : i32 to index
      %48 = memref.load %arg1[%c5, %47] : memref<13x100xf32, #tpu.memory_space<smem>>
      %c6 = arith.constant 6 : index
      %49 = arith.index_cast %arg9 : i32 to index
      %50 = memref.load %arg1[%c6, %49] : memref<13x100xf32, #tpu.memory_space<smem>>
      %c7 = arith.constant 7 : index
      %51 = arith.index_cast %arg9 : i32 to index
      %52 = memref.load %arg1[%c7, %51] : memref<13x100xf32, #tpu.memory_space<smem>>
      %c8 = arith.constant 8 : index
      %53 = arith.index_cast %arg9 : i32 to index
      %54 = memref.load %arg1[%c8, %53] : memref<13x100xf32, #tpu.memory_space<smem>>
      %c9 = arith.constant 9 : index
      %55 = arith.index_cast %arg9 : i32 to index
      %56 = memref.load %arg1[%c9, %55] : memref<13x100xf32, #tpu.memory_space<smem>>
      %c10 = arith.constant 10 : index
      %57 = arith.index_cast %arg9 : i32 to index
      %58 = memref.load %arg1[%c10, %57] : memref<13x100xf32, #tpu.memory_space<smem>>
      %c11 = arith.constant 11 : index
      %59 = arith.index_cast %arg9 : i32 to index
      %60 = memref.load %arg1[%c11, %59] : memref<13x100xf32, #tpu.memory_space<smem>>
      %c12 = arith.constant 12 : index
      %61 = arith.index_cast %arg9 : i32 to index
      %62 = memref.load %arg1[%c12, %61] : memref<13x100xf32, #tpu.memory_space<smem>>
      %63 = vector.broadcast %38 : f32 to vector<2x8xf32>
      %64 = arith.mulf %arg10, %63 : vector<2x8xf32>
      %65 = vector.broadcast %44 : f32 to vector<2x8xf32>
      %66 = arith.addf %64, %65 : vector<2x8xf32>
      %67 = vector.broadcast %40 : f32 to vector<2x8xf32>
      %68 = arith.mulf %arg10, %67 : vector<2x8xf32>
      %69 = vector.broadcast %46 : f32 to vector<2x8xf32>
      %70 = arith.addf %68, %69 : vector<2x8xf32>
      %71 = vector.broadcast %42 : f32 to vector<2x8xf32>
      %72 = arith.mulf %arg10, %71 : vector<2x8xf32>
      %73 = vector.broadcast %48 : f32 to vector<2x8xf32>
      %74 = arith.addf %72, %73 : vector<2x8xf32>
      %75 = vector.shape_cast %66 : vector<2x8xf32> to vector<2x8x1xf32>
      %76 = vector.shape_cast %70 : vector<2x8xf32> to vector<2x1x8xf32>
      %77 = vector.broadcast %75 : vector<2x8x1xf32> to vector<2x8x8xf32>
      %78 = vector.broadcast %76 : vector<2x1x8xf32> to vector<2x8x8xf32>
      %79 = arith.mulf %77, %78 : vector<2x8x8xf32>
      %cst_16 = arith.constant dense<0xFF800000> : vector<2x8xf32>
      %80 = vector.multi_reduction <maximumf>, %79, %cst_16 [2] : vector<2x8x8xf32> to vector<2x8xf32>
      %81 = vector.shape_cast %80 : vector<2x8xf32> to vector<2x8x1xf32>
      %82 = vector.broadcast %81 : vector<2x8x1xf32> to vector<2x8x8xf32>
      %83 = arith.subf %79, %82 : vector<2x8x8xf32>
      %84 = math.exp %83 : vector<2x8x8xf32>
      %cst_17 = arith.constant dense<0.000000e+00> : vector<2x8xf32>
      %85 = vector.multi_reduction <add>, %84, %cst_17 [2] : vector<2x8x8xf32> to vector<2x8xf32>
      %86 = vector.shape_cast %85 : vector<2x8xf32> to vector<2x8x1xf32>
      %87 = vector.broadcast %86 : vector<2x8x1xf32> to vector<2x8x8xf32>
      %88 = arith.divf %84, %87 : vector<2x8x8xf32>
      %89 = vector.shape_cast %74 : vector<2x8xf32> to vector<2x1x8xf32>
      %90 = vector.broadcast %89 : vector<2x1x8xf32> to vector<2x8x8xf32>
      %91 = arith.mulf %88, %90 : vector<2x8x8xf32>
      %cst_18 = arith.constant dense<0.000000e+00> : vector<2x8xf32>
      %92 = vector.multi_reduction <add>, %91, %cst_18 [2] : vector<2x8x8xf32> to vector<2x8xf32>
      %93 = vector.broadcast %50 : f32 to vector<2x8xf32>
      %94 = arith.mulf %92, %93 : vector<2x8xf32>
      %95 = vector.broadcast %52 : f32 to vector<2x8xf32>
      %96 = arith.addf %94, %95 : vector<2x8xf32>
      %97 = arith.addf %arg10, %96 : vector<2x8xf32>
      %98 = arith.subf %97, %97 : vector<2x8xf32>
      %99 = arith.mulf %98, %98 : vector<2x8xf32>
      %cst_19 = arith.constant 9.99999974E-6 : f32
      %100 = vector.broadcast %cst_19 : f32 to vector<2x8xf32>
      %101 = arith.addf %99, %100 : vector<2x8xf32>
      %102 = math.rsqrt %101 : vector<2x8xf32>
      %103 = arith.mulf %98, %102 : vector<2x8xf32>
      %104 = vector.broadcast %56 : f32 to vector<2x8xf32>
      %105 = arith.mulf %103, %104 : vector<2x8xf32>
      %106 = vector.broadcast %58 : f32 to vector<2x8xf32>
      %107 = arith.addf %105, %106 : vector<2x8xf32>
      %108 = vector.shape_cast %107 : vector<2x8xf32> to vector<2x8x1xf32>
      %cst_20 = arith.constant 0.000000e+00 : f32
      %109 = vector.broadcast %cst_20 : f32 to vector<2x8xf32>
      %c0_i32_21 = arith.constant 0 : i32
      %c4_i32 = arith.constant 4 : i32
      %110 = arith.muli %arg9, %c4_i32 : i32
      %111 = arith.addi %110, %c0_i32_21 : i32
      %c0_22 = arith.constant 0 : index
      %112 = arith.index_cast %111 : i32 to index
      %c0_23 = arith.constant 0 : index
      %113 = vector.load %arg6[%c0_22, %112, %c0_23] : memref<3x400x512xf32, #tpu.memory_space<vmem>>, vector<1x1x512xf32>
      %114 = vector.shape_cast %113 : vector<1x1x512xf32> to vector<1x512xf32>
      %c1_24 = arith.constant 1 : index
      %115 = arith.index_cast %111 : i32 to index
      %c0_25 = arith.constant 0 : index
      %116 = vector.load %arg6[%c1_24, %115, %c0_25] : memref<3x400x512xf32, #tpu.memory_space<vmem>>, vector<1x1x512xf32>
      %117 = vector.shape_cast %116 : vector<1x1x512xf32> to vector<1x512xf32>
      %c2_26 = arith.constant 2 : index
      %118 = arith.index_cast %111 : i32 to index
      %c0_27 = arith.constant 0 : index
      %119 = vector.load %arg6[%c2_26, %118, %c0_27] : memref<3x400x512xf32, #tpu.memory_space<vmem>>, vector<1x1x512xf32>
      %120 = vector.shape_cast %119 : vector<1x1x512xf32> to vector<1x512xf32>
      %121 = vector.shape_cast %114 : vector<1x512xf32> to vector<1x1x512xf32>
      %122 = vector.broadcast %108 : vector<2x8x1xf32> to vector<2x8x512xf32>
      %123 = vector.broadcast %121 : vector<1x1x512xf32> to vector<2x8x512xf32>
      %124 = arith.mulf %122, %123 : vector<2x8x512xf32>
      %125 = vector.shape_cast %117 : vector<1x512xf32> to vector<1x1x512xf32>
      %126 = vector.broadcast %125 : vector<1x1x512xf32> to vector<2x8x512xf32>
      %127 = arith.addf %124, %126 : vector<2x8x512xf32>
      %cst_28 = arith.constant 0.000000e+00 : f32
      %128 = vector.broadcast %cst_28 : f32 to vector<2x8x512xf32>
      %129 = arith.maximumf %127, %128 : vector<2x8x512xf32>
      %130 = vector.shape_cast %120 : vector<1x512xf32> to vector<1x1x512xf32>
      %131 = vector.broadcast %130 : vector<1x1x512xf32> to vector<2x8x512xf32>
      %132 = arith.mulf %129, %131 : vector<2x8x512xf32>
      %cst_29 = arith.constant dense<0.000000e+00> : vector<2x8xf32>
      %133 = vector.multi_reduction <add>, %132, %cst_29 [2] : vector<2x8x512xf32> to vector<2x8xf32>
      %134 = arith.addf %109, %133 : vector<2x8xf32>
      %c1_i32_30 = arith.constant 1 : i32
      %c4_i32_31 = arith.constant 4 : i32
      %135 = arith.muli %arg9, %c4_i32_31 : i32
      %136 = arith.addi %135, %c1_i32_30 : i32
      %c0_32 = arith.constant 0 : index
      %137 = arith.index_cast %136 : i32 to index
      %c0_33 = arith.constant 0 : index
      %138 = vector.load %arg6[%c0_32, %137, %c0_33] : memref<3x400x512xf32, #tpu.memory_space<vmem>>, vector<1x1x512xf32>
      %139 = vector.shape_cast %138 : vector<1x1x512xf32> to vector<1x512xf32>
      %c1_34 = arith.constant 1 : index
      %140 = arith.index_cast %136 : i32 to index
      %c0_35 = arith.constant 0 : index
      %141 = vector.load %arg6[%c1_34, %140, %c0_35] : memref<3x400x512xf32, #tpu.memory_space<vmem>>, vector<1x1x512xf32>
      %142 = vector.shape_cast %141 : vector<1x1x512xf32> to vector<1x512xf32>
      %c2_36 = arith.constant 2 : index
      %143 = arith.index_cast %136 : i32 to index
      %c0_37 = arith.constant 0 : index
      %144 = vector.load %arg6[%c2_36, %143, %c0_37] : memref<3x400x512xf32, #tpu.memory_space<vmem>>, vector<1x1x512xf32>
      %145 = vector.shape_cast %144 : vector<1x1x512xf32> to vector<1x512xf32>
      %146 = vector.shape_cast %139 : vector<1x512xf32> to vector<1x1x512xf32>
      %147 = vector.broadcast %108 : vector<2x8x1xf32> to vector<2x8x512xf32>
      %148 = vector.broadcast %146 : vector<1x1x512xf32> to vector<2x8x512xf32>
      %149 = arith.mulf %147, %148 : vector<2x8x512xf32>
      %150 = vector.shape_cast %142 : vector<1x512xf32> to vector<1x1x512xf32>
      %151 = vector.broadcast %150 : vector<1x1x512xf32> to vector<2x8x512xf32>
      %152 = arith.addf %149, %151 : vector<2x8x512xf32>
      %cst_38 = arith.constant 0.000000e+00 : f32
      %153 = vector.broadcast %cst_38 : f32 to vector<2x8x512xf32>
      %154 = arith.maximumf %152, %153 : vector<2x8x512xf32>
      %155 = vector.shape_cast %145 : vector<1x512xf32> to vector<1x1x512xf32>
      %156 = vector.broadcast %155 : vector<1x1x512xf32> to vector<2x8x512xf32>
      %157 = arith.mulf %154, %156 : vector<2x8x512xf32>
      %cst_39 = arith.constant dense<0.000000e+00> : vector<2x8xf32>
      %158 = vector.multi_reduction <add>, %157, %cst_39 [2] : vector<2x8x512xf32> to vector<2x8xf32>
      %159 = arith.addf %134, %158 : vector<2x8xf32>
      %c2_i32 = arith.constant 2 : i32
      %c4_i32_40 = arith.constant 4 : i32
      %160 = arith.muli %arg9, %c4_i32_40 : i32
      %161 = arith.addi %160, %c2_i32 : i32
      %c0_41 = arith.constant 0 : index
      %162 = arith.index_cast %161 : i32 to index
      %c0_42 = arith.constant 0 : index
      %163 = vector.load %arg6[%c0_41, %162, %c0_42] : memref<3x400x512xf32, #tpu.memory_space<vmem>>, vector<1x1x512xf32>
      %164 = vector.shape_cast %163 : vector<1x1x512xf32> to vector<1x512xf32>
      %c1_43 = arith.constant 1 : index
      %165 = arith.index_cast %161 : i32 to index
      %c0_44 = arith.constant 0 : index
      %166 = vector.load %arg6[%c1_43, %165, %c0_44] : memref<3x400x512xf32, #tpu.memory_space<vmem>>, vector<1x1x512xf32>
      %167 = vector.shape_cast %166 : vector<1x1x512xf32> to vector<1x512xf32>
      %c2_45 = arith.constant 2 : index
      %168 = arith.index_cast %161 : i32 to index
      %c0_46 = arith.constant 0 : index
      %169 = vector.load %arg6[%c2_45, %168, %c0_46] : memref<3x400x512xf32, #tpu.memory_space<vmem>>, vector<1x1x512xf32>
      %170 = vector.shape_cast %169 : vector<1x1x512xf32> to vector<1x512xf32>
      %171 = vector.shape_cast %164 : vector<1x512xf32> to vector<1x1x512xf32>
      %172 = vector.broadcast %108 : vector<2x8x1xf32> to vector<2x8x512xf32>
      %173 = vector.broadcast %171 : vector<1x1x512xf32> to vector<2x8x512xf32>
      %174 = arith.mulf %172, %173 : vector<2x8x512xf32>
      %175 = vector.shape_cast %167 : vector<1x512xf32> to vector<1x1x512xf32>
      %176 = vector.broadcast %175 : vector<1x1x512xf32> to vector<2x8x512xf32>
      %177 = arith.addf %174, %176 : vector<2x8x512xf32>
      %cst_47 = arith.constant 0.000000e+00 : f32
      %178 = vector.broadcast %cst_47 : f32 to vector<2x8x512xf32>
      %179 = arith.maximumf %177, %178 : vector<2x8x512xf32>
      %180 = vector.shape_cast %170 : vector<1x512xf32> to vector<1x1x512xf32>
      %181 = vector.broadcast %180 : vector<1x1x512xf32> to vector<2x8x512xf32>
      %182 = arith.mulf %179, %181 : vector<2x8x512xf32>
      %cst_48 = arith.constant dense<0.000000e+00> : vector<2x8xf32>
      %183 = vector.multi_reduction <add>, %182, %cst_48 [2] : vector<2x8x512xf32> to vector<2x8xf32>
      %184 = arith.addf %159, %183 : vector<2x8xf32>
      %c3_i32 = arith.constant 3 : i32
      %c4_i32_49 = arith.constant 4 : i32
      %185 = arith.muli %arg9, %c4_i32_49 : i32
      %186 = arith.addi %185, %c3_i32 : i32
      %c0_50 = arith.constant 0 : index
      %187 = arith.index_cast %186 : i32 to index
      %c0_51 = arith.constant 0 : index
      %188 = vector.load %arg6[%c0_50, %187, %c0_51] : memref<3x400x512xf32, #tpu.memory_space<vmem>>, vector<1x1x512xf32>
      %189 = vector.shape_cast %188 : vector<1x1x512xf32> to vector<1x512xf32>
      %c1_52 = arith.constant 1 : index
      %190 = arith.index_cast %186 : i32 to index
      %c0_53 = arith.constant 0 : index
      %191 = vector.load %arg6[%c1_52, %190, %c0_53] : memref<3x400x512xf32, #tpu.memory_space<vmem>>, vector<1x1x512xf32>
      %192 = vector.shape_cast %191 : vector<1x1x512xf32> to vector<1x512xf32>
      %c2_54 = arith.constant 2 : index
      %193 = arith.index_cast %186 : i32 to index
      %c0_55 = arith.constant 0 : index
      %194 = vector.load %arg6[%c2_54, %193, %c0_55] : memref<3x400x512xf32, #tpu.memory_space<vmem>>, vector<1x1x512xf32>
      %195 = vector.shape_cast %194 : vector<1x1x512xf32> to vector<1x512xf32>
      %196 = vector.shape_cast %189 : vector<1x512xf32> to vector<1x1x512xf32>
      %197 = vector.broadcast %108 : vector<2x8x1xf32> to vector<2x8x512xf32>
      %198 = vector.broadcast %196 : vector<1x1x512xf32> to vector<2x8x512xf32>
      %199 = arith.mulf %197, %198 : vector<2x8x512xf32>
      %200 = vector.shape_cast %192 : vector<1x512xf32> to vector<1x1x512xf32>
      %201 = vector.broadcast %200 : vector<1x1x512xf32> to vector<2x8x512xf32>
      %202 = arith.addf %199, %201 : vector<2x8x512xf32>
      %cst_56 = arith.constant 0.000000e+00 : f32
      %203 = vector.broadcast %cst_56 : f32 to vector<2x8x512xf32>
      %204 = arith.maximumf %202, %203 : vector<2x8x512xf32>
      %205 = vector.shape_cast %195 : vector<1x512xf32> to vector<1x1x512xf32>
      %206 = vector.broadcast %205 : vector<1x1x512xf32> to vector<2x8x512xf32>
      %207 = arith.mulf %204, %206 : vector<2x8x512xf32>
      %cst_57 = arith.constant dense<0.000000e+00> : vector<2x8xf32>
      %208 = vector.multi_reduction <add>, %207, %cst_57 [2] : vector<2x8x512xf32> to vector<2x8xf32>
      %209 = arith.addf %184, %208 : vector<2x8xf32>
      %c4_i32_58 = arith.constant 4 : i32
      %210 = vector.broadcast %54 : f32 to vector<2x8xf32>
      %211 = arith.addf %209, %210 : vector<2x8xf32>
      %212 = arith.addf %107, %211 : vector<2x8xf32>
      %213 = arith.subf %212, %212 : vector<2x8xf32>
      %214 = arith.mulf %213, %213 : vector<2x8xf32>
      %cst_59 = arith.constant 9.99999974E-6 : f32
      %215 = vector.broadcast %cst_59 : f32 to vector<2x8xf32>
      %216 = arith.addf %214, %215 : vector<2x8xf32>
      %217 = math.rsqrt %216 : vector<2x8xf32>
      %218 = arith.mulf %213, %217 : vector<2x8xf32>
      %219 = vector.broadcast %60 : f32 to vector<2x8xf32>
      %220 = arith.mulf %218, %219 : vector<2x8xf32>
      %221 = vector.broadcast %62 : f32 to vector<2x8xf32>
      %222 = arith.addf %220, %221 : vector<2x8xf32>
      scf.yield %222 : vector<2x8xf32>
    }
    %c100_i32_1 = arith.constant 100 : i32
    %c0_2 = arith.constant 0 : index
    %3 = memref.load %arg2[%c0_2] : memref<2xf32, #tpu.memory_space<smem>>
    %c1 = arith.constant 1 : index
    %4 = memref.load %arg2[%c1] : memref<2xf32, #tpu.memory_space<smem>>
    %5 = arith.subf %2, %2 : vector<2x8xf32>
    %6 = arith.mulf %5, %5 : vector<2x8xf32>
    %cst = arith.constant 9.99999974E-6 : f32
    %7 = vector.broadcast %cst : f32 to vector<2x8xf32>
    %8 = arith.addf %6, %7 : vector<2x8xf32>
    %9 = math.rsqrt %8 : vector<2x8xf32>
    %10 = arith.mulf %5, %9 : vector<2x8xf32>
    %11 = vector.broadcast %3 : f32 to vector<2x8xf32>
    %12 = arith.mulf %10, %11 : vector<2x8xf32>
    %13 = vector.broadcast %4 : f32 to vector<2x8xf32>
    %14 = arith.addf %12, %13 : vector<2x8xf32>
    %c0_i32_3 = arith.constant 0 : i32
    %c100_i32_4 = arith.constant 100 : i32
    %15 = arith.addi %c0_i32_3, %c100_i32_4 : i32
    %c1_i32_5 = arith.constant 1 : i32
    %16 = scf.for %arg9 = %c0_i32_3 to %15 step %c1_i32_5 iter_args(%arg10 = %0) -> (vector<2x8xf32>)  : i32 {
      %c0_12 = arith.constant 0 : index
      %37 = arith.index_cast %arg9 : i32 to index
      %38 = memref.load %arg3[%c0_12, %37] : memref<23x100xf32, #tpu.memory_space<smem>>
      %c1_13 = arith.constant 1 : index
      %39 = arith.index_cast %arg9 : i32 to index
      %40 = memref.load %arg3[%c1_13, %39] : memref<23x100xf32, #tpu.memory_space<smem>>
      %c2_14 = arith.constant 2 : index
      %41 = arith.index_cast %arg9 : i32 to index
      %42 = memref.load %arg3[%c2_14, %41] : memref<23x100xf32, #tpu.memory_space<smem>>
      %c3_15 = arith.constant 3 : index
      %43 = arith.index_cast %arg9 : i32 to index
      %44 = memref.load %arg3[%c3_15, %43] : memref<23x100xf32, #tpu.memory_space<smem>>
      %c4 = arith.constant 4 : index
      %45 = arith.index_cast %arg9 : i32 to index
      %46 = memref.load %arg3[%c4, %45] : memref<23x100xf32, #tpu.memory_space<smem>>
      %c5 = arith.constant 5 : index
      %47 = arith.index_cast %arg9 : i32 to index
      %48 = memref.load %arg3[%c5, %47] : memref<23x100xf32, #tpu.memory_space<smem>>
      %c6 = arith.constant 6 : index
      %49 = arith.index_cast %arg9 : i32 to index
      %50 = memref.load %arg3[%c6, %49] : memref<23x100xf32, #tpu.memory_space<smem>>
      %c7 = arith.constant 7 : index
      %51 = arith.index_cast %arg9 : i32 to index
      %52 = memref.load %arg3[%c7, %51] : memref<23x100xf32, #tpu.memory_space<smem>>
      %c8 = arith.constant 8 : index
      %53 = arith.index_cast %arg9 : i32 to index
      %54 = memref.load %arg3[%c8, %53] : memref<23x100xf32, #tpu.memory_space<smem>>
      %c9 = arith.constant 9 : index
      %55 = arith.index_cast %arg9 : i32 to index
      %56 = memref.load %arg3[%c9, %55] : memref<23x100xf32, #tpu.memory_space<smem>>
      %c10 = arith.constant 10 : index
      %57 = arith.index_cast %arg9 : i32 to index
      %58 = memref.load %arg3[%c10, %57] : memref<23x100xf32, #tpu.memory_space<smem>>
      %c11 = arith.constant 11 : index
      %59 = arith.index_cast %arg9 : i32 to index
      %60 = memref.load %arg3[%c11, %59] : memref<23x100xf32, #tpu.memory_space<smem>>
      %c12 = arith.constant 12 : index
      %61 = arith.index_cast %arg9 : i32 to index
      %62 = memref.load %arg3[%c12, %61] : memref<23x100xf32, #tpu.memory_space<smem>>
      %c13 = arith.constant 13 : index
      %63 = arith.index_cast %arg9 : i32 to index
      %64 = memref.load %arg3[%c13, %63] : memref<23x100xf32, #tpu.memory_space<smem>>
      %c14 = arith.constant 14 : index
      %65 = arith.index_cast %arg9 : i32 to index
      %66 = memref.load %arg3[%c14, %65] : memref<23x100xf32, #tpu.memory_space<smem>>
      %c15 = arith.constant 15 : index
      %67 = arith.index_cast %arg9 : i32 to index
      %68 = memref.load %arg3[%c15, %67] : memref<23x100xf32, #tpu.memory_space<smem>>
      %c16 = arith.constant 16 : index
      %69 = arith.index_cast %arg9 : i32 to index
      %70 = memref.load %arg3[%c16, %69] : memref<23x100xf32, #tpu.memory_space<smem>>
      %c17 = arith.constant 17 : index
      %71 = arith.index_cast %arg9 : i32 to index
      %72 = memref.load %arg3[%c17, %71] : memref<23x100xf32, #tpu.memory_space<smem>>
      %c18 = arith.constant 18 : index
      %73 = arith.index_cast %arg9 : i32 to index
      %74 = memref.load %arg3[%c18, %73] : memref<23x100xf32, #tpu.memory_space<smem>>
      %c19 = arith.constant 19 : index
      %75 = arith.index_cast %arg9 : i32 to index
      %76 = memref.load %arg3[%c19, %75] : memref<23x100xf32, #tpu.memory_space<smem>>
      %c20 = arith.constant 20 : index
      %77 = arith.index_cast %arg9 : i32 to index
      %78 = memref.load %arg3[%c20, %77] : memref<23x100xf32, #tpu.memory_space<smem>>
      %c21 = arith.constant 21 : index
      %79 = arith.index_cast %arg9 : i32 to index
      %80 = memref.load %arg3[%c21, %79] : memref<23x100xf32, #tpu.memory_space<smem>>
      %c22 = arith.constant 22 : index
      %81 = arith.index_cast %arg9 : i32 to index
      %82 = memref.load %arg3[%c22, %81] : memref<23x100xf32, #tpu.memory_space<smem>>
      %83 = vector.broadcast %38 : f32 to vector<2x8xf32>
      %84 = arith.mulf %arg10, %83 : vector<2x8xf32>
      %85 = vector.broadcast %44 : f32 to vector<2x8xf32>
      %86 = arith.addf %84, %85 : vector<2x8xf32>
      %87 = vector.broadcast %40 : f32 to vector<2x8xf32>
      %88 = arith.mulf %arg10, %87 : vector<2x8xf32>
      %89 = vector.broadcast %46 : f32 to vector<2x8xf32>
      %90 = arith.addf %88, %89 : vector<2x8xf32>
      %91 = vector.broadcast %42 : f32 to vector<2x8xf32>
      %92 = arith.mulf %arg10, %91 : vector<2x8xf32>
      %93 = vector.broadcast %48 : f32 to vector<2x8xf32>
      %94 = arith.addf %92, %93 : vector<2x8xf32>
      %95 = vector.shape_cast %86 : vector<2x8xf32> to vector<2x8x1xf32>
      %96 = vector.shape_cast %90 : vector<2x8xf32> to vector<2x1x8xf32>
      %97 = vector.broadcast %95 : vector<2x8x1xf32> to vector<2x8x8xf32>
      %98 = vector.broadcast %96 : vector<2x1x8xf32> to vector<2x8x8xf32>
      %99 = arith.mulf %97, %98 : vector<2x8x8xf32>
      %cst_16 = arith.constant dense<0xFF800000> : vector<2x8xf32>
      %100 = vector.multi_reduction <maximumf>, %99, %cst_16 [2] : vector<2x8x8xf32> to vector<2x8xf32>
      %101 = vector.shape_cast %100 : vector<2x8xf32> to vector<2x8x1xf32>
      %102 = vector.broadcast %101 : vector<2x8x1xf32> to vector<2x8x8xf32>
      %103 = arith.subf %99, %102 : vector<2x8x8xf32>
      %104 = math.exp %103 : vector<2x8x8xf32>
      %cst_17 = arith.constant dense<0.000000e+00> : vector<2x8xf32>
      %105 = vector.multi_reduction <add>, %104, %cst_17 [2] : vector<2x8x8xf32> to vector<2x8xf32>
      %106 = vector.shape_cast %105 : vector<2x8xf32> to vector<2x8x1xf32>
      %107 = vector.broadcast %106 : vector<2x8x1xf32> to vector<2x8x8xf32>
      %108 = arith.divf %104, %107 : vector<2x8x8xf32>
      %109 = vector.shape_cast %94 : vector<2x8xf32> to vector<2x1x8xf32>
      %110 = vector.broadcast %109 : vector<2x1x8xf32> to vector<2x8x8xf32>
      %111 = arith.mulf %108, %110 : vector<2x8x8xf32>
      %cst_18 = arith.constant dense<0.000000e+00> : vector<2x8xf32>
      %112 = vector.multi_reduction <add>, %111, %cst_18 [2] : vector<2x8x8xf32> to vector<2x8xf32>
      %113 = vector.broadcast %50 : f32 to vector<2x8xf32>
      %114 = arith.mulf %112, %113 : vector<2x8xf32>
      %115 = vector.broadcast %52 : f32 to vector<2x8xf32>
      %116 = arith.addf %114, %115 : vector<2x8xf32>
      %117 = arith.addf %arg10, %116 : vector<2x8xf32>
      %118 = arith.subf %117, %117 : vector<2x8xf32>
      %119 = arith.mulf %118, %118 : vector<2x8xf32>
      %cst_19 = arith.constant 9.99999974E-6 : f32
      %120 = vector.broadcast %cst_19 : f32 to vector<2x8xf32>
      %121 = arith.addf %119, %120 : vector<2x8xf32>
      %122 = math.rsqrt %121 : vector<2x8xf32>
      %123 = arith.mulf %118, %122 : vector<2x8xf32>
      %124 = vector.broadcast %72 : f32 to vector<2x8xf32>
      %125 = arith.mulf %123, %124 : vector<2x8xf32>
      %126 = vector.broadcast %74 : f32 to vector<2x8xf32>
      %127 = arith.addf %125, %126 : vector<2x8xf32>
      %128 = vector.broadcast %54 : f32 to vector<2x8xf32>
      %129 = arith.mulf %127, %128 : vector<2x8xf32>
      %130 = vector.broadcast %60 : f32 to vector<2x8xf32>
      %131 = arith.addf %129, %130 : vector<2x8xf32>
      %132 = vector.broadcast %56 : f32 to vector<2x8xf32>
      %133 = arith.mulf %14, %132 : vector<2x8xf32>
      %134 = vector.broadcast %62 : f32 to vector<2x8xf32>
      %135 = arith.addf %133, %134 : vector<2x8xf32>
      %136 = vector.broadcast %58 : f32 to vector<2x8xf32>
      %137 = arith.mulf %14, %136 : vector<2x8xf32>
      %138 = vector.broadcast %64 : f32 to vector<2x8xf32>
      %139 = arith.addf %137, %138 : vector<2x8xf32>
      %140 = vector.shape_cast %131 : vector<2x8xf32> to vector<2x8x1xf32>
      %141 = vector.shape_cast %135 : vector<2x8xf32> to vector<2x1x8xf32>
      %142 = vector.broadcast %140 : vector<2x8x1xf32> to vector<2x8x8xf32>
      %143 = vector.broadcast %141 : vector<2x1x8xf32> to vector<2x8x8xf32>
      %144 = arith.mulf %142, %143 : vector<2x8x8xf32>
      %cst_20 = arith.constant dense<0xFF800000> : vector<2x8xf32>
      %145 = vector.multi_reduction <maximumf>, %144, %cst_20 [2] : vector<2x8x8xf32> to vector<2x8xf32>
      %146 = vector.shape_cast %145 : vector<2x8xf32> to vector<2x8x1xf32>
      %147 = vector.broadcast %146 : vector<2x8x1xf32> to vector<2x8x8xf32>
      %148 = arith.subf %144, %147 : vector<2x8x8xf32>
      %149 = math.exp %148 : vector<2x8x8xf32>
      %cst_21 = arith.constant dense<0.000000e+00> : vector<2x8xf32>
      %150 = vector.multi_reduction <add>, %149, %cst_21 [2] : vector<2x8x8xf32> to vector<2x8xf32>
      %151 = vector.shape_cast %150 : vector<2x8xf32> to vector<2x8x1xf32>
      %152 = vector.broadcast %151 : vector<2x8x1xf32> to vector<2x8x8xf32>
      %153 = arith.divf %149, %152 : vector<2x8x8xf32>
      %154 = vector.shape_cast %139 : vector<2x8xf32> to vector<2x1x8xf32>
      %155 = vector.broadcast %154 : vector<2x1x8xf32> to vector<2x8x8xf32>
      %156 = arith.mulf %153, %155 : vector<2x8x8xf32>
      %cst_22 = arith.constant dense<0.000000e+00> : vector<2x8xf32>
      %157 = vector.multi_reduction <add>, %156, %cst_22 [2] : vector<2x8x8xf32> to vector<2x8xf32>
      %158 = vector.broadcast %66 : f32 to vector<2x8xf32>
      %159 = arith.mulf %157, %158 : vector<2x8xf32>
      %160 = vector.broadcast %68 : f32 to vector<2x8xf32>
      %161 = arith.addf %159, %160 : vector<2x8xf32>
      %162 = arith.addf %127, %161 : vector<2x8xf32>
      %163 = arith.subf %162, %162 : vector<2x8xf32>
      %164 = arith.mulf %163, %163 : vector<2x8xf32>
      %cst_23 = arith.constant 9.99999974E-6 : f32
      %165 = vector.broadcast %cst_23 : f32 to vector<2x8xf32>
      %166 = arith.addf %164, %165 : vector<2x8xf32>
      %167 = math.rsqrt %166 : vector<2x8xf32>
      %168 = arith.mulf %163, %167 : vector<2x8xf32>
      %169 = vector.broadcast %76 : f32 to vector<2x8xf32>
      %170 = arith.mulf %168, %169 : vector<2x8xf32>
      %171 = vector.broadcast %78 : f32 to vector<2x8xf32>
      %172 = arith.addf %170, %171 : vector<2x8xf32>
      %173 = vector.shape_cast %172 : vector<2x8xf32> to vector<2x8x1xf32>
      %cst_24 = arith.constant 0.000000e+00 : f32
      %174 = vector.broadcast %cst_24 : f32 to vector<2x8xf32>
      %c0_i32_25 = arith.constant 0 : i32
      %c4_i32 = arith.constant 4 : i32
      %175 = arith.muli %arg9, %c4_i32 : i32
      %176 = arith.addi %175, %c0_i32_25 : i32
      %c0_26 = arith.constant 0 : index
      %177 = arith.index_cast %176 : i32 to index
      %c0_27 = arith.constant 0 : index
      %178 = vector.load %arg7[%c0_26, %177, %c0_27] : memref<3x400x512xf32, #tpu.memory_space<vmem>>, vector<1x1x512xf32>
      %179 = vector.shape_cast %178 : vector<1x1x512xf32> to vector<1x512xf32>
      %c1_28 = arith.constant 1 : index
      %180 = arith.index_cast %176 : i32 to index
      %c0_29 = arith.constant 0 : index
      %181 = vector.load %arg7[%c1_28, %180, %c0_29] : memref<3x400x512xf32, #tpu.memory_space<vmem>>, vector<1x1x512xf32>
      %182 = vector.shape_cast %181 : vector<1x1x512xf32> to vector<1x512xf32>
      %c2_30 = arith.constant 2 : index
      %183 = arith.index_cast %176 : i32 to index
      %c0_31 = arith.constant 0 : index
      %184 = vector.load %arg7[%c2_30, %183, %c0_31] : memref<3x400x512xf32, #tpu.memory_space<vmem>>, vector<1x1x512xf32>
      %185 = vector.shape_cast %184 : vector<1x1x512xf32> to vector<1x512xf32>
      %186 = vector.shape_cast %179 : vector<1x512xf32> to vector<1x1x512xf32>
      %187 = vector.broadcast %173 : vector<2x8x1xf32> to vector<2x8x512xf32>
      %188 = vector.broadcast %186 : vector<1x1x512xf32> to vector<2x8x512xf32>
      %189 = arith.mulf %187, %188 : vector<2x8x512xf32>
      %190 = vector.shape_cast %182 : vector<1x512xf32> to vector<1x1x512xf32>
      %191 = vector.broadcast %190 : vector<1x1x512xf32> to vector<2x8x512xf32>
      %192 = arith.addf %189, %191 : vector<2x8x512xf32>
      %cst_32 = arith.constant 0.000000e+00 : f32
      %193 = vector.broadcast %cst_32 : f32 to vector<2x8x512xf32>
      %194 = arith.maximumf %192, %193 : vector<2x8x512xf32>
      %195 = vector.shape_cast %185 : vector<1x512xf32> to vector<1x1x512xf32>
      %196 = vector.broadcast %195 : vector<1x1x512xf32> to vector<2x8x512xf32>
      %197 = arith.mulf %194, %196 : vector<2x8x512xf32>
      %cst_33 = arith.constant dense<0.000000e+00> : vector<2x8xf32>
      %198 = vector.multi_reduction <add>, %197, %cst_33 [2] : vector<2x8x512xf32> to vector<2x8xf32>
      %199 = arith.addf %174, %198 : vector<2x8xf32>
      %c1_i32_34 = arith.constant 1 : i32
      %c4_i32_35 = arith.constant 4 : i32
      %200 = arith.muli %arg9, %c4_i32_35 : i32
      %201 = arith.addi %200, %c1_i32_34 : i32
      %c0_36 = arith.constant 0 : index
      %202 = arith.index_cast %201 : i32 to index
      %c0_37 = arith.constant 0 : index
      %203 = vector.load %arg7[%c0_36, %202, %c0_37] : memref<3x400x512xf32, #tpu.memory_space<vmem>>, vector<1x1x512xf32>
      %204 = vector.shape_cast %203 : vector<1x1x512xf32> to vector<1x512xf32>
      %c1_38 = arith.constant 1 : index
      %205 = arith.index_cast %201 : i32 to index
      %c0_39 = arith.constant 0 : index
      %206 = vector.load %arg7[%c1_38, %205, %c0_39] : memref<3x400x512xf32, #tpu.memory_space<vmem>>, vector<1x1x512xf32>
      %207 = vector.shape_cast %206 : vector<1x1x512xf32> to vector<1x512xf32>
      %c2_40 = arith.constant 2 : index
      %208 = arith.index_cast %201 : i32 to index
      %c0_41 = arith.constant 0 : index
      %209 = vector.load %arg7[%c2_40, %208, %c0_41] : memref<3x400x512xf32, #tpu.memory_space<vmem>>, vector<1x1x512xf32>
      %210 = vector.shape_cast %209 : vector<1x1x512xf32> to vector<1x512xf32>
      %211 = vector.shape_cast %204 : vector<1x512xf32> to vector<1x1x512xf32>
      %212 = vector.broadcast %173 : vector<2x8x1xf32> to vector<2x8x512xf32>
      %213 = vector.broadcast %211 : vector<1x1x512xf32> to vector<2x8x512xf32>
      %214 = arith.mulf %212, %213 : vector<2x8x512xf32>
      %215 = vector.shape_cast %207 : vector<1x512xf32> to vector<1x1x512xf32>
      %216 = vector.broadcast %215 : vector<1x1x512xf32> to vector<2x8x512xf32>
      %217 = arith.addf %214, %216 : vector<2x8x512xf32>
      %cst_42 = arith.constant 0.000000e+00 : f32
      %218 = vector.broadcast %cst_42 : f32 to vector<2x8x512xf32>
      %219 = arith.maximumf %217, %218 : vector<2x8x512xf32>
      %220 = vector.shape_cast %210 : vector<1x512xf32> to vector<1x1x512xf32>
      %221 = vector.broadcast %220 : vector<1x1x512xf32> to vector<2x8x512xf32>
      %222 = arith.mulf %219, %221 : vector<2x8x512xf32>
      %cst_43 = arith.constant dense<0.000000e+00> : vector<2x8xf32>
      %223 = vector.multi_reduction <add>, %222, %cst_43 [2] : vector<2x8x512xf32> to vector<2x8xf32>
      %224 = arith.addf %199, %223 : vector<2x8xf32>
      %c2_i32 = arith.constant 2 : i32
      %c4_i32_44 = arith.constant 4 : i32
      %225 = arith.muli %arg9, %c4_i32_44 : i32
      %226 = arith.addi %225, %c2_i32 : i32
      %c0_45 = arith.constant 0 : index
      %227 = arith.index_cast %226 : i32 to index
      %c0_46 = arith.constant 0 : index
      %228 = vector.load %arg7[%c0_45, %227, %c0_46] : memref<3x400x512xf32, #tpu.memory_space<vmem>>, vector<1x1x512xf32>
      %229 = vector.shape_cast %228 : vector<1x1x512xf32> to vector<1x512xf32>
      %c1_47 = arith.constant 1 : index
      %230 = arith.index_cast %226 : i32 to index
      %c0_48 = arith.constant 0 : index
      %231 = vector.load %arg7[%c1_47, %230, %c0_48] : memref<3x400x512xf32, #tpu.memory_space<vmem>>, vector<1x1x512xf32>
      %232 = vector.shape_cast %231 : vector<1x1x512xf32> to vector<1x512xf32>
      %c2_49 = arith.constant 2 : index
      %233 = arith.index_cast %226 : i32 to index
      %c0_50 = arith.constant 0 : index
      %234 = vector.load %arg7[%c2_49, %233, %c0_50] : memref<3x400x512xf32, #tpu.memory_space<vmem>>, vector<1x1x512xf32>
      %235 = vector.shape_cast %234 : vector<1x1x512xf32> to vector<1x512xf32>
      %236 = vector.shape_cast %229 : vector<1x512xf32> to vector<1x1x512xf32>
      %237 = vector.broadcast %173 : vector<2x8x1xf32> to vector<2x8x512xf32>
      %238 = vector.broadcast %236 : vector<1x1x512xf32> to vector<2x8x512xf32>
      %239 = arith.mulf %237, %238 : vector<2x8x512xf32>
      %240 = vector.shape_cast %232 : vector<1x512xf32> to vector<1x1x512xf32>
      %241 = vector.broadcast %240 : vector<1x1x512xf32> to vector<2x8x512xf32>
      %242 = arith.addf %239, %241 : vector<2x8x512xf32>
      %cst_51 = arith.constant 0.000000e+00 : f32
      %243 = vector.broadcast %cst_51 : f32 to vector<2x8x512xf32>
      %244 = arith.maximumf %242, %243 : vector<2x8x512xf32>
      %245 = vector.shape_cast %235 : vector<1x512xf32> to vector<1x1x512xf32>
      %246 = vector.broadcast %245 : vector<1x1x512xf32> to vector<2x8x512xf32>
      %247 = arith.mulf %244, %246 : vector<2x8x512xf32>
      %cst_52 = arith.constant dense<0.000000e+00> : vector<2x8xf32>
      %248 = vector.multi_reduction <add>, %247, %cst_52 [2] : vector<2x8x512xf32> to vector<2x8xf32>
      %249 = arith.addf %224, %248 : vector<2x8xf32>
      %c3_i32 = arith.constant 3 : i32
      %c4_i32_53 = arith.constant 4 : i32
      %250 = arith.muli %arg9, %c4_i32_53 : i32
      %251 = arith.addi %250, %c3_i32 : i32
      %c0_54 = arith.constant 0 : index
      %252 = arith.index_cast %251 : i32 to index
      %c0_55 = arith.constant 0 : index
      %253 = vector.load %arg7[%c0_54, %252, %c0_55] : memref<3x400x512xf32, #tpu.memory_space<vmem>>, vector<1x1x512xf32>
      %254 = vector.shape_cast %253 : vector<1x1x512xf32> to vector<1x512xf32>
      %c1_56 = arith.constant 1 : index
      %255 = arith.index_cast %251 : i32 to index
      %c0_57 = arith.constant 0 : index
      %256 = vector.load %arg7[%c1_56, %255, %c0_57] : memref<3x400x512xf32, #tpu.memory_space<vmem>>, vector<1x1x512xf32>
      %257 = vector.shape_cast %256 : vector<1x1x512xf32> to vector<1x512xf32>
      %c2_58 = arith.constant 2 : index
      %258 = arith.index_cast %251 : i32 to index
      %c0_59 = arith.constant 0 : index
      %259 = vector.load %arg7[%c2_58, %258, %c0_59] : memref<3x400x512xf32, #tpu.memory_space<vmem>>, vector<1x1x512xf32>
      %260 = vector.shape_cast %259 : vector<1x1x512xf32> to vector<1x512xf32>
      %261 = vector.shape_cast %254 : vector<1x512xf32> to vector<1x1x512xf32>
      %262 = vector.broadcast %173 : vector<2x8x1xf32> to vector<2x8x512xf32>
      %263 = vector.broadcast %261 : vector<1x1x512xf32> to vector<2x8x512xf32>
      %264 = arith.mulf %262, %263 : vector<2x8x512xf32>
      %265 = vector.shape_cast %257 : vector<1x512xf32> to vector<1x1x512xf32>
      %266 = vector.broadcast %265 : vector<1x1x512xf32> to vector<2x8x512xf32>
      %267 = arith.addf %264, %266 : vector<2x8x512xf32>
      %cst_60 = arith.constant 0.000000e+00 : f32
      %268 = vector.broadcast %cst_60 : f32 to vector<2x8x512xf32>
      %269 = arith.maximumf %267, %268 : vector<2x8x512xf32>
      %270 = vector.shape_cast %260 : vector<1x512xf32> to vector<1x1x512xf32>
      %271 = vector.broadcast %270 : vector<1x1x512xf32> to vector<2x8x512xf32>
      %272 = arith.mulf %269, %271 : vector<2x8x512xf32>
      %cst_61 = arith.constant dense<0.000000e+00> : vector<2x8xf32>
      %273 = vector.multi_reduction <add>, %272, %cst_61 [2] : vector<2x8x512xf32> to vector<2x8xf32>
      %274 = arith.addf %249, %273 : vector<2x8xf32>
      %c4_i32_62 = arith.constant 4 : i32
      %275 = vector.broadcast %70 : f32 to vector<2x8xf32>
      %276 = arith.addf %274, %275 : vector<2x8xf32>
      %277 = arith.addf %172, %276 : vector<2x8xf32>
      %278 = arith.subf %277, %277 : vector<2x8xf32>
      %279 = arith.mulf %278, %278 : vector<2x8xf32>
      %cst_63 = arith.constant 9.99999974E-6 : f32
      %280 = vector.broadcast %cst_63 : f32 to vector<2x8xf32>
      %281 = arith.addf %279, %280 : vector<2x8xf32>
      %282 = math.rsqrt %281 : vector<2x8xf32>
      %283 = arith.mulf %278, %282 : vector<2x8xf32>
      %284 = vector.broadcast %80 : f32 to vector<2x8xf32>
      %285 = arith.mulf %283, %284 : vector<2x8xf32>
      %286 = vector.broadcast %82 : f32 to vector<2x8xf32>
      %287 = arith.addf %285, %286 : vector<2x8xf32>
      scf.yield %287 : vector<2x8xf32>
    }
    %c100_i32_6 = arith.constant 100 : i32
    %c0_7 = arith.constant 0 : index
    %17 = memref.load %arg4[%c0_7] : memref<4xf32, #tpu.memory_space<smem>>
    %c1_8 = arith.constant 1 : index
    %18 = memref.load %arg4[%c1_8] : memref<4xf32, #tpu.memory_space<smem>>
    %19 = arith.subf %16, %16 : vector<2x8xf32>
    %20 = arith.mulf %19, %19 : vector<2x8xf32>
    %cst_9 = arith.constant 9.99999974E-6 : f32
    %21 = vector.broadcast %cst_9 : f32 to vector<2x8xf32>
    %22 = arith.addf %20, %21 : vector<2x8xf32>
    %23 = math.rsqrt %22 : vector<2x8xf32>
    %24 = arith.mulf %19, %23 : vector<2x8xf32>
    %25 = vector.broadcast %17 : f32 to vector<2x8xf32>
    %26 = arith.mulf %24, %25 : vector<2x8xf32>
    %27 = vector.broadcast %18 : f32 to vector<2x8xf32>
    %28 = arith.addf %26, %27 : vector<2x8xf32>
    %29 = vector.extract_strided_slice %28 {offsets = [0, 7], sizes = [2, 1], strides = [1, 1]} : vector<2x8xf32> to vector<2x1xf32>
    %c2 = arith.constant 2 : index
    %30 = memref.load %arg4[%c2] : memref<4xf32, #tpu.memory_space<smem>>
    %31 = vector.broadcast %30 : f32 to vector<2x1xf32>
    %32 = arith.mulf %29, %31 : vector<2x1xf32>
    %c3 = arith.constant 3 : index
    %33 = memref.load %arg4[%c3] : memref<4xf32, #tpu.memory_space<smem>>
    %34 = vector.broadcast %33 : f32 to vector<2x1xf32>
    %35 = arith.addf %32, %34 : vector<2x1xf32>
    %c0_10 = arith.constant 0 : index
    %c0_11 = arith.constant 0 : index
    %36 = vector.load %arg8[%c0_10, %c0_11] : memref<2x1xf32, #tpu.memory_space<vmem>>, vector<2x1xf32>
    tpu.vector_store %arg8[%c0_10, %c0_11], %35 {strides = array<i32>} : memref<2x1xf32, #tpu.memory_space<vmem>>, vector<2x1xf32>,
    return
  }
  func.func @transform_0(%arg0: i32, %arg1: memref<13x100xf32, #tpu.memory_space<smem>>, %arg2: memref<2xf32, #tpu.memory_space<smem>>, %arg3: memref<23x100xf32, #tpu.memory_space<smem>>, %arg4: memref<4xf32, #tpu.memory_space<smem>>) -> (i32, i32) {
    %c0_i32 = arith.constant 0 : i32
    %c0_i32_0 = arith.constant 0 : i32
    %c0_i32_1 = arith.constant 0 : i32
    return %c0_i32, %c0_i32_0 : i32, i32
  }
  func.func @transform_1(%arg0: i32, %arg1: memref<13x100xf32, #tpu.memory_space<smem>>, %arg2: memref<2xf32, #tpu.memory_space<smem>>, %arg3: memref<23x100xf32, #tpu.memory_space<smem>>, %arg4: memref<4xf32, #tpu.memory_space<smem>>) -> (i32, i32, i32) {
    %c0_i32 = arith.constant 0 : i32
    %c0_i32_0 = arith.constant 0 : i32
    %c0_i32_1 = arith.constant 0 : i32
    %c0_i32_2 = arith.constant 0 : i32
    return %c0_i32, %c0_i32_0, %c0_i32_1 : i32, i32, i32
  }
  func.func @transform_2(%arg0: i32, %arg1: memref<13x100xf32, #tpu.memory_space<smem>>, %arg2: memref<2xf32, #tpu.memory_space<smem>>, %arg3: memref<23x100xf32, #tpu.memory_space<smem>>, %arg4: memref<4xf32, #tpu.memory_space<smem>>) -> (i32, i32, i32) {
    %c0_i32 = arith.constant 0 : i32
    %c0_i32_0 = arith.constant 0 : i32
    %c0_i32_1 = arith.constant 0 : i32
    %c0_i32_2 = arith.constant 0 : i32
    return %c0_i32, %c0_i32_0, %c0_i32_1 : i32, i32, i32
  }
  func.func @transform_3(%arg0: i32, %arg1: memref<13x100xf32, #tpu.memory_space<smem>>, %arg2: memref<2xf32, #tpu.memory_space<smem>>, %arg3: memref<23x100xf32, #tpu.memory_space<smem>>, %arg4: memref<4xf32, #tpu.memory_space<smem>>) -> (i32, i32) {
    %c0_i32 = arith.constant 0 : i32
    %c0_i32_0 = arith.constant 0 : i32
    %c0_i32_1 = arith.constant 0 : i32
    return %c0_i32, %c0_i32_0 : i32, i32
  }
}

</mosaic_0001>

<bundles_post_ra>
// kernel: transformer_forward.1
= control target key start
LH: loop header
LB: loop body
LE: loop exit
PB: predicated region body
PF: predicated region fallthrough
CT: control target
= control target key end

     0   :  { %s3225_s0 = inlined_call_operand.hbm [shape: f32[13,100], index: 0, kind: input, shape index: {}]   ;;  %s3226_s4 = inlined_call_operand.hbm [shape: f32[2,8], index: 4, kind: input, shape index: {}]   ;;  %s3227_s5 = inlined_call_operand.hbm [shape: f32[3,400,512], index: 5, kind: input, shape index: {}]   ;;  %s3228_s6 = inlined_call_operand.hbm [shape: f32[3,400,512], index: 6, kind: input, shape index: {}]   ;;  %s3229_s7 = inlined_call_operand.vmem [shape: f32[2,1], index: 7, kind: output, shape index: {}]   ;;  %s3230_s1 = inlined_call_operand.hbm [shape: f32[2], index: 1, kind: input, shape index: {}]   ;;  %s3231_s2 = inlined_call_operand.hbm [shape: f32[23,100], index: 2, kind: input, shape index: {}]   ;;  %s3232_s3 = inlined_call_operand.hbm [shape: f32[4], index: 3, kind: input, shape index: {}]  }
   0x1   :  { %s2143_s26 = scalar_lea.hbm %s3225_s0, 256 }
   0x2   :  { %p2144_p0 = scmp.ne.s32.totalorder %s3225_s0, %s2143_s26  ;;  %p2147_p1 = scmp.lt.u32.totalorder %s2143_s26, %s3225_s0 }
   0x4   :  { %p2149_p2 = pnand %p2147_p1, %p2144_p0 }
   0x6   :  { %2152 = shalt.err (!%p2149_p2)  }
   0x7   :  { %s2287_s8 = smov [#allocation3]   ;;  %s2153_s13 = scalar_lea.hbm %s3230_s1, 16 }
   0x8   :  { %13 = dma.hbm_to_smem %s3225_s0, 256, %s2287_s8, [#allocation2] }
   0x9   :  { %p2154_p3 = scmp.ne.s32.totalorder %s3230_s1, %s2153_s13  ;;  %p2157_p4 = scmp.lt.u32.totalorder %s2153_s13, %s3230_s1 }
   0xb   :  { %p2159_p5 = pnand %p2157_p4, %p2154_p3 }
   0xd   :  { %2162 = shalt.err (!%p2159_p5)  }
   0xe   :  { %s2288_s18 = smov [#allocation4]   ;;  %s2163_s22 = scalar_lea.hbm %s3231_s2, 384 }
   0xf   :  { %15 = dma.hbm_to_smem %s3230_s1, 16, %s2288_s18, [#allocation2] }
  0x10   :  { %p2164_p6 = scmp.ne.s32.totalorder %s3231_s2, %s2163_s22  ;;  %p2167_p7 = scmp.lt.u32.totalorder %s2163_s22, %s3231_s2 }
  0x12   :  { %p2169_p8 = pnand %p2167_p7, %p2164_p6 }
  0x14   :  { %2172 = shalt.err (!%p2169_p8)  }
  0x15   :  { %s2289_s27 = smov [#allocation5]   ;;  %s2173_s8 = scalar_lea.hbm %s3232_s3, 16 }
  0x16   :  { %17 = dma.hbm_to_smem %s3231_s2, 384, %s2289_s27, [#allocation2] }
  0x17   :  { %p2174_p9 = scmp.ne.s32.totalorder %s3232_s3, %s2173_s8  ;;  %p2177_p10 = scmp.lt.u32.totalorder %s2173_s8, %s3232_s3 }
  0x19   :  { %p2179_p11 = pnand %p2177_p10, %p2174_p9 }
  0x1b   :  { %2182 = shalt.err (!%p2179_p11)  }
  0x1c   :  { %s2290_s13 = smov [#allocation6]  }
  0x1d   :  { %19 = dma.hbm_to_smem %s3232_s3, 16, %s2290_s13, [#allocation2] }
  0x1e   :  { %2265 = dma.done.wait [#allocation2], 672 }
  0x1f   :  { %2266 = vsyncadd [#allocation2], 4294966624 }
  0x20   :  { %21 = sfence }
  0x21   :  { %22 = vsyncpa [#allocation8], 0 }
  0x22   :  { %23 = vsyncpa [#allocation10], 0  ;;  %s2291_s2 = smov [#allocation9]   ;;  %s2183_s19 = scalar_lea.hbm %s3227_s5, 76800 }
  0x23   :  { %s39_s16 = sshll.u32 %s2291_s2, 4  ;;  %p2184_p12 = scmp.ne.s32.totalorder %s3227_s5, %s2183_s19  ;;  %s40_s16 = int_to_ptr.vmem [resolvable:$true] %s39_s16 }
  0x24   :  { %p2187_p13 = scmp.lt.u32.totalorder %s2183_s19, %s3227_s5 }
  0x26   :  { %p2189_p0 = pnand %p2187_p13, %p2184_p12 }
  0x28   :  { %2192 = shalt.err (!%p2189_p0)
}
  0x29   :  { %s2193_s3 = scalar_lea.vmem %s40_s16, 76800  ;;  %p2198_p2 = scmp.lt.s32.totalorder %s40_s16, %s40_s16 }
  0x2a   :  { %p2194_p1 = scmp.ne.s32.totalorder %s40_s16, %s2193_s3  ;;  %p2199_p3 = scmp.lt.s32.totalorder %s2193_s3, %s2193_s3 }
  0x2c   :  { %p2200_p4 = por %p2199_p3, %p2198_p2 }
  0x2e   :  { %p2201_p5 = pnand %p2200_p4, %p2194_p1 }
  0x30   :  { %2204 = shalt.err (!%p2201_p5)
}
  0x31   :  { %s2292_s23 = smov 512   ;;  %s2293_s24 = smov 32  }
  0x32   :  { %45 = dma.hbm_to_vmem [thread:$0]  %s3227_s5, 76800, %s40_s16, [#allocation10], %s2292_s23, %s2292_s23, %s2293_s24  }
  0x33   :  { %s2294_s27 = smov [#allocation7]   ;;  %s2295_s29 = smov [#allocation11]  }
  0x34   :  { %s30_s28 = sshll.u32 %s2294_s27, 4  ;;  %s51_s1 = sshll.u32 %s2295_s29, 4  ;;  %s31_s28 = int_to_ptr.vmem [resolvable:$true] %s30_s28  ;;  %s52_s1 = int_to_ptr.vmem [resolvable:$true] %s51_s1 }
  0x35   :  { %s2205_s9 = scalar_lea.hbm %s3226_s4, 32 }
  0x36   :  { %p2206_p6 = scmp.ne.s32.totalorder %s3226_s4, %s2205_s9  ;;  %p2209_p7 = scmp.lt.u32.totalorder %s2205_s9, %s3226_s4 }
  0x38   :  { %p2211_p8 = pnand %p2209_p7, %p2206_p6 }
  0x3a   :  { %2214 = shalt.err (!%p2211_p8)
}
  0x3b   :  { %s2215_s5 = scalar_lea.vmem %s31_s28, 32  ;;  %p2220_p10 = scmp.lt.s32.totalorder %s31_s28, %s31_s28 }
  0x3c   :  { %p2216_p9 = scmp.ne.s32.totalorder %s31_s28, %s2215_s5  ;;  %p2221_p11 = scmp.lt.s32.totalorder %s2215_s5, %s2215_s5 }
  0x3e   :  { %p2222_p12 = por %p2221_p11, %p2220_p10 }
  0x40   :  { %p2223_p13 = pnand %p2222_p12, %p2216_p9 }
  0x42   :  { %2226 = shalt.err (!%p2223_p13)
}
  0x43   :  { %33 = dma.hbm_to_vmem [thread:$0]  %s3226_s4, 32, %s31_s28, [#allocation8]  }
  0x44   :  { %s2227_s17 = scalar_lea.hbm %s3228_s6, 76800 }
  0x45   :  { %p2228_p0 = scmp.ne.s32.totalorder %s3228_s6, %s2227_s17  ;;  %p2231_p1 = scmp.lt.u32.totalorder %s2227_s17, %s3228_s6 }
  0x47   :  { %p2233_p2 = pnand %p2231_p1, %p2228_p0 }
  0x49   :  { %2236 = shalt.err (!%p2233_p2)
}
  0x4a   :  { %s2237_s21 = scalar_lea.vmem %s52_s1, 76800  ;;  %p2242_p4 = scmp.lt.s32.totalorder %s52_s1, %s52_s1 }
  0x4b   :  { %p2238_p3 = scmp.ne.s32.totalorder %s52_s1, %s2237_s21  ;;  %p2243_p5 = scmp.lt.s32.totalorder %s2237_s21, %s2237_s21 }
  0x4d   :  { %p2244_p6 = por %p2243_p5, %p2242_p4 }
  0x4f   :  { %p2245_p7 = pnand %p2244_p6, %p2238_p3 }
  0x51   :  { %2248 = shalt.err (!%p2245_p7)
}
  0x52   :  { %57 = dma.hbm_to_vmem [thread:$0]  %s3228_s6, 76800, %s52_s1, [#allocation10], %s2292_s23, %s2292_s23, %s2293_s24  }
  0x53   :  { %2267 = dma.done.wait [#allocation8], 32  }
  0x54   :  { %2268 = vsyncadd [#allocation8], 4294967264 }
  0x55   :  { %2269 = dma.done.wait [#allocation10], 153600  }
  0x56   :  { %2270 = vsyncadd [#allocation10], 4294813696  ;;  %v2428_v0 = vld [vmem:[#allocation7] sm:$0x3]   ;;  %s2433_s3 = smov 0  }
  0x57   :  { %3267 = vst [vmem:[#allocation15_spill] sm:$0xff] %v2428_v0  ;;  %v3268_v1 = vmov %v2428_v0 }
  0x58 LB: > { %s75_s6 = sld [smem:[#allocation3 + %s2277_s3]]  ;;  %s76_s23 = sshra.s32 %s2277_s3, 7  ;;  %v140_v2 = vlaneseq  ;;  %v2296_v12 = vmov 1966171168   ;;  %vm189_vm0 = vcmask 64512   ;;  %vm271_vm1 = vcmask 1041409   ;;  %s2277_s3 = sphi %s2433_s3, %s73_s3   ;;  %v2273_v1 = vphi %v3268_v1, %v3292_v1  }
  0x59   : > { %s2443_s24 = sshll.u32 %s76_s23, 7  ;;  %s2446_s25 = sand.u32 127, %s2277_s3  ;;  %v156_v13 = vunpack.c.l.s4 %v2296_v12 }
  0x5a   : > { %s1991_s26 = sadd.s32 384, %s2443_s24  ;;  %v2451_v3 = vshrl.u32 %v140_v2, 7  ;;  %s1987_s29 = sadd.s32 128, %s2443_s24 }
  0x5b   : > { %s90_s27 = sadd.s32 %s1991_s26, %s2446_s25  ;;  %s82_s1 = sadd.s32 %s1987_s29, %s2446_s25  ;;  %v157_v16 = vunpack.c.0.s8 %v156_v13 }
  0x5c   : > { %s91_s28 = sld [smem:[#allocation3 + %s90_s27]]  ;;  %v2455_v6 = vsub.s32 0, %v2451_v3  ;;  %v2458_v9 = vsub.s32 1, %v2451_v3  ;;  %s1993_s30 = sadd.s32 512, %s2443_s24 }
  0x5d   : > { %s83_s8 = sld [smem:[#allocation3 + %s82_s1]]  ;;  %s94_s9 = sadd.s32 %s1993_s30, %s2446_s25  ;;  %v2468_v19 = vsub.s32 %v157_v16, %v2451_v3 }
  0x5e   : > { %v128_v4 = vstv %s75_s6  ;;  %3269 = vst [vmem:[#allocation16_spill] sm:$0xff] %v2455_v6  ;;  %3270 = vst [vmem:[#allocation17_spill] sm:$0xff] %v2458_v9  ;;  %s95_s10 = sld [smem:[#allocation3 + %s94_s9]]  ;;  %s1989_s11 = sadd.s32 256, %s2443_s24 }
  0x5f   : > { %v129_v5 = vmul.f32 %v2273_v1, %v128_v4  ;;  %3271 = vst [vmem:[#allocation18_spill] sm:$0xff] %v2468_v19  ;;  %s86_s12 = sadd.s32 %s1989_s11, %s2446_s25  ;;  %s1995_s13 = sadd.s32 640, %s2443_s24  ;;  %v262_v4 = vand.u32 127, %v140_v2 }
  0x60   : > { %s87_s5 = sld [smem:[#allocation3 + %s86_s12]]  ;;  %s98_s14 = sadd.s32 %s1995_s13, %s2446_s25 }
  0x61   : > { %s99_s15 = sld [smem:[#allocation3 + %s98_s14]]  ;;  %s1997_s2 = sadd.s32 768, %s2443_s24 }
  0x62   : > { %v130_v7 = vstv %s91_s28  ;;  %s102_s16 = sadd.s32 %s1997_s2, %s2446_s25  ;;  %s1999_s17 = sadd.s32 896, %s2443_s24 }
  0x63   : > { %v131_v8 = vadd.f32 %v130_v7, %v129_v5  ;;  %v132_v14 = vstv %s83_s8  ;;  %s103_s18 = sld [smem:[#allocation3 + %s102_s16]]  ;;  %s106_s19 = sadd.s32 %s1999_s17, %s2446_s25 }
  0x64   : > { %v133_v15 = vmul.f32 %v2273_v1, %v132_v14  ;;  %v134_v17 = vstv %s95_s10  ;;  %s107_s20 = sld [smem:[#allocation3 + %s106_s19]]  ;;  %s2003_s0 = sadd.s32 1152, %s2443_s24 }
  0x65   : > { %v143_v10 = vrot.slane %v131_v8, %v2455_v6  ;;  %v150_v11 = vrot.slane %v131_v8, %v2458_v9  ;;  %s2005_s21 = sadd.s32 1280, %s2443_s24  ;;  %s114_s4 = sadd.s32 %s2003_s0, %s2446_s25 }
  0x66   : > { %v135_v18 = vadd.f32 %v134_v17, %v133_v15  ;;  %v136_v42 = vstv %s87_s5  ;;  %s118_s22 = sadd.s32 %s2005_s21, %s2446_s25  ;;  %s115_s6 = sld [smem:[#allocation3 + %s114_s4]] }
  0x67   : > { %145 = vbcast.lane.b32.xlu0 %v143_v10, 256  ;;  %v137_v43 = vmul.f32 %v2273_v1, %v136_v42  ;;  %v138_v44 = vstv %s99_s15  ;;  %v2497_v10 = vsub.s32 %v262_v4, %v2451_v3  ;;  %s119_s23 = sld [smem:[#allocation3 + %s118_s22]]  ;;  %s1910_s26 = sshll.u32 %s2277_s3, 2 }
  0x68   : > { %v161_v20 = vrot.slane %v135_v18, %v2468_v19  ;;  %s299_s27 = sshra.s32 %s1910_s26, 3  ;;  %s421_s28 = sadd.s32 1, %s1910_s26 }
  0x69   : > { %v139_v45 = vadd.f32 %v138_v44, %v137_v43  ;;  %v253_v62 = vstv %s103_s18  ;;  %3272 = vst [vmem:[#allocation19_spill] sm:$0xff] %v2497_v10  ;;  %s302_s29 = sand.u32 7, %s1910_s26  ;;  %s2010_s1 = sshll.u32 %s299_s27, 5 }
  0x6a   : > { %v169_v21 = vrot.slane %v161_v20, %v2468_v19  ;;  %v162_v22 = vcombine.high %v161_v20, %v161_v20  ;;  %v256_v7 = vstv %s107_s20  ;;  %s422_s30 = sshra.s32 %s421_s28, 3  ;;  %s544_s8 = sadd.s32 2, %s1910_s26 }
  0x6b   : > { %152 = vbcast.lane.b32.xlu0 %v150_v11, 256  ;;  %v219_v47 = vrot.slane %v139_v45, %v2468_v19  ;;  %s305_s9 = sadd.s32 %s2010_s1, %s302_s29  ;;  %s667_s10 = sadd.s32 3, %s1910_s26 }
  0x6c   : > { %v180_v23 = vrot.slane %v169_v21, %v2455_v6  ;;  %v176_v24 = vrot.slane %v162_v22, %v2468_v19  ;;  %v280_v22 = vstv %s115_s6  ;;  %s425_s11 = sand.u32 7, %s421_s28  ;;  %s2011_s12 = sshll.u32 %s422_s30, 5 }
  0x6d   : > { %v227_v49 = vrot.slane %v219_v47, %v2468_v19  ;;  %v220_v50 = vcombine.high %v219_v47, %v219_v47  ;;  %s545_s13 = sshra.s32 %s544_s8, 3  ;;  %s668_s5 = sshra.s32 %s667_s10, 3 }
  0x6e   : > { %v184_v27 = vrot.slane %v176_v24, %v2455_v6  ;;  %v282_v24 = vstv %s119_s23  ;;  %s428_s14 = sadd.s32 %s2011_s12, %s425_s11  ;;  %s548_s15 = sand.u32 7, %s544_s8 }
  0x6f   : > { %v238_v51 = vrot.slane %v227_v49, %v2455_v6  ;;  %v234_v52 = vrot.slane %v220_v50, %v2468_v19  ;;  %s2012_s2 = sshll.u32 %s545_s13, 5  ;;  %s671_s16 = sand.u32 7, %s667_s10 }
  0x70   : > { %s2013_s17 = sshll.u32 %s668_s5, 5  ;;  %s306_s18 = scalar_lea.vmem [#allocation9], %s305_s9 }
  0x71   : > { %v242_v56 = vrot.slane %v234_v52, %v2455_v6  ;;  %s551_s19 = sadd.s32 %s2012_s2, %s548_s15  ;;  %s674_s20 = sadd.s32 %s2013_s17, %s671_s16 }
  0x72   : > { %s429_s0 = scalar_lea.vmem [#allocation9], %s428_s14  ;;  %s552_s21 = scalar_lea.vmem [#allocation9], %s551_s19 }
  0x73   : > { %v1922_v42 = vld [vmem:[%s429_s0 + $0xc80] ss:$8 sm:$0xf]  ;;  %s675_s4 = scalar_lea.vmem [#allocation9], %s674_s20  ;;  %s2001_s22 = sadd.s32 1024, %s2443_s24 }
  0x74   : > { %s110_s6 = sadd.s32 %s2001_s22, %s2446_s25  ;;  %s2007_s26 = sadd.s32 1408, %s2443_s24 }
  0x75   : > { %s111_s23 = sld [smem:[#allocation3 + %s110_s6]]  ;;  %s2009_s27 = sadd.s32 1536, %s2443_s24 }
  0x76   : > { %s122_s28 = sadd.s32 %s2007_s26, %s2446_s25  ;;  %s126_s29 = sadd.s32 %s2009_s27, %s2446_s25 }
  0x77   : > { %s123_s1 = sld [smem:[#allocation3 + %s122_s28]]  ;;  %s73_s3 = sadd.s32 1, %s2277_s3  }
  0x78   : > { %s127_s30 = sld [smem:[#allocation3 + %s126_s29]]  ;;  %p70_p8 = scmp.ge.s32.totalorder %s73_s3, 100  }
  0x79   :  { %s815_s24 = sld [smem:[#allocation4]] (%p70_p8)  ;;  %s1935_s25 = sld [smem:[#allocation4 + $0x1]] (%p70_p8) }
  0x7a   :  { %s2816_s8 = smov (%p70_p8), 0  }
  0xd9   : > { %v146_v25 = vpop.permute.xlu0 %145 }
  0xda   : > { %v187_v26 = vmul.f32 %v180_v23, %v146_v25 }
  0xdc   : > { %v190_v28 = vsel %vm189_vm0, %v187_v26, -inf }
  0xdd   : > { %191 = vmax.xlane.f32.xlu1 %v190_v28  ;;  %v153_v29 = vpop.permute.xlu0 %152  ;;  %v2515_v28 = vsub.s32 2, %v2451_v3 }
  0xde   : > { %v188_v30 = vmul.f32 %v184_v27, %v153_v29  ;;  %v2518_v29 = vsub.s32 3, %v2451_v3  ;;  %v1920_v3 = vld [vmem:[%s429_s0 + $0x640] ss:$8 sm:$0xf] }
  0xdf   : > { %3274 = vst [vmem:[#allocation21_spill] sm:$0xff] %v2515_v28  ;;  %v2557_v47 = vrot.slane %v1920_v3, %v2455_v6  ;;  %v2563_v49 = vrot.slane %v1920_v3, %v2515_v28 }
  0xe0   : > { %v193_v31 = vsel %vm189_vm0, %v188_v30, -inf  ;;  %3275 = vst [vmem:[#allocation22_spill] sm:$0xff] %v2518_v29  ;;  %v2566_v50 = vrot.slane %v1920_v3, %v2518_v29 }
  0xe1   : > { %194 = vmax.xlane.f32.xlu1 %v193_v31  ;;  %v1914_v31 = vld [vmem:[%s306_s18 + $0x640] ss:$8 sm:$0xf] }
 0x16a   : > { %v192_v32 = vpop.xlane.xlu1 %191 }
 0x16b   : > { %v196_v33 = vsub.f32 %v187_v26, %v192_v32  ;;  %v430_v32 = vld [vmem:[%s429_s0] ss:$8 sm:$0xf] }
 0x16c   : > { %v2545_v43 = vrot.slane %v430_v32, %v2455_v6  ;;  %v2548_v44 = vrot.slane %v430_v32, %v2458_v9  ;;  %v2551_v45 = vrot.slane %v430_v32, %v2515_v28 }
 0x16d   : > { %v198_v34 = vmul.f32 1.442695, %v196_v33 }
 0x16e   : > { %v195_v35 = vpop.xlane.xlu1 %194 }
 0x16f   : > { %2105 = vpow2.f32 %v198_v34  ;;  %v197_v36 = vsub.f32 %v188_v30, %v195_v35  ;;  %v307_v30 = vld [vmem:[%s306_s18] ss:$8 sm:$0xf] }
 0x170   : > { %v2521_v33 = vrot.slane %v307_v30, %v2455_v6  ;;  %v2524_v34 = vrot.slane %v307_v30, %v2458_v9  ;;  %v2527_v35 = vrot.slane %v307_v30, %v2515_v28 }
 0x171   : > { %v200_v37 = vmul.f32 1.442695, %v197_v36  ;;  %v2530_v36 = vrot.slane %v307_v30, %v2518_v29 }
 0x173   : > { %2107 = vpow2.f32 %v200_v37  ;;  %v1916_v37 = vld [vmem:[%s306_s18 + $0xc80] ss:$8 sm:$0xf] }
 0x174   : > { %v2569_v52 = vrot.slane %v1916_v37, %v2455_v6 }
 0x179   : > { %v2106_v38 = vpop.eup %2105 }
 0x17a   : > { %v202_v39 = vsel %vm189_vm0, %v2106_v38, 0.0 }
 0x17b   : > { %203 = vadd.xlane.f32.xlu0 %v202_v39  ;;  %v2536_v39 = vrot.slane %v1914_v31, %v2458_v9 }
 0x17d   : > { %v2108_v40 = vpop.eup %2107 }
 0x17e   : > { %v205_v41 = vsel %vm189_vm0, %v2108_v40, 0.0 }
 0x17f   : > { %206 = vadd.xlane.f32.xlu1 %v205_v41  ;;  %v2542_v41 = vrot.slane %v1914_v31, %v2518_v29 }
 0x208   : > { %v204_v46 = vpop.xlane.xlu0 %203 }
 0x209   : > { %2109 = vrcp.f32 %v204_v46  ;;  %v2554_v46 = vrot.slane %v430_v32, %v2518_v29 }
 0x20c   : > { %v207_v48 = vpop.xlane.xlu1 %206 }
 0x20d   : > { %2111 = vrcp.f32 %v207_v48  ;;  %v2560_v48 = vrot.slane %v1920_v3, %v2458_v9 }
 0x213   : > { %v2110_v53 = vpop.eup %2109 }
 0x214   : > { %v209_v54 = vmul.f32 %v2110_v53, %v2106_v38  ;;  %v2533_v38 = vrot.slane %v1914_v31, %v2455_v6  ;;  %v2572_v53 = vrot.slane %v1916_v37, %v2458_v9 }
 0x216   : > { %v245_v55 = vmul.f32 %v238_v51, %v209_v54  ;;  %v553_v51 = vld [vmem:[%s552_s21] ss:$8 sm:$0xf]  ;;  %v2575_v54 = vrot.slane %v1916_v37, %v2515_v28 }
 0x217   : > { %v2112_v57 = vpop.eup %2111  ;;  %v2596_v4 = vrot.slane %v553_v51, %v2458_v9 }
 0x218   : > { %v247_v58 = vsel %vm189_vm0, %v245_v55, 0.0  ;;  %v211_v59 = vmul.f32 %v2112_v57, %v2108_v40  ;;  %v2539_v40 = vrot.slane %v1914_v31, %v2515_v28  ;;  %v2578_v55 = vrot.slane %v1916_v37, %v2518_v29 }
 0x219   : > { %248 = vadd.xlane.f32.xlu1 %v247_v58  ;;  %v2581_v57 = vrot.slane %v1922_v42, %v2455_v6  ;;  %v2584_v58 = vrot.slane %v1922_v42, %v2458_v9 }
 0x21a   : > { %v246_v60 = vmul.f32 %v242_v56, %v211_v59  ;;  %v676_v56 = vld [vmem:[%s675_s4] ss:$8 sm:$0xf]  ;;  %v2587_v59 = vrot.slane %v1922_v42, %v2515_v28 }
 0x21c   : > { %v250_v61 = vsel %vm189_vm0, %v246_v60, 0.0  ;;  %v2590_v60 = vrot.slane %v1922_v42, %v2518_v29 }
 0x21d   : > { %251 = vadd.xlane.f32.xlu1 %v250_v61  ;;  %v1926_v61 = vld [vmem:[%s552_s21 + $0x640] ss:$8 sm:$0xf] }
 0x2a6   : > { %v249_v63 = vpop.xlane.xlu1 %248 }
 0x2a7   : > { %v254_v5 = vmul.f32 %v253_v62, %v249_v63  ;;  %v2593_v63 = vrot.slane %v553_v51, %v2455_v6 }
 0x2a9   : > { %v257_v11 = vadd.f32 %v256_v7, %v254_v5  ;;  %v2599_v5 = vrot.slane %v553_v51, %v2515_v28 }
 0x2aa   : > { %v252_v8 = vpop.xlane.xlu1 %251 }
 0x2ab   : > { %v255_v12 = vmul.f32 %v253_v62, %v252_v8  ;;  %v266_v14 = vrot.slane %v257_v11, %v2497_v10  ;;  %v1928_v62 = vld [vmem:[%s552_s21 + $0xc80] ss:$8 sm:$0xf]  ;;  %v2605_v11 = vrot.slane %v676_v56, %v2455_v6 }
 0x2ac   : > { %v1932_v8 = vld [vmem:[%s675_s4 + $0x640] ss:$8 sm:$0xf] }
 0x2ad   : > { %v258_v13 = vadd.f32 %v256_v7, %v255_v12  ;;  %v2602_v7 = vrot.slane %v553_v51, %v2518_v29  ;;  %v2608_v12 = vrot.slane %v676_v56, %v2458_v9 }
 0x2af   : > { %v270_v15 = vrot.slane %v258_v13, %v2497_v10  ;;  %v2611_v13 = vrot.slane %v676_v56, %v2515_v28 }
 0x2b1   : > { %v272_v16 = vsel %vm271_vm1, %v270_v15, %v266_v14  ;;  %v2614_v14 = vrot.slane %v676_v56, %v2518_v29  ;;  %v2617_v15 = vrot.slane %v1926_v61, %v2455_v6 }
 0x2b2   : > { %v274_v2 = vadd.f32 %v2273_v1, %v272_v16  ;;  %v2620_v16 = vrot.slane %v1926_v61, %v2458_v9 }
 0x2b4   : > { %v275_v17 = vsub.f32 %v274_v2, %v274_v2  ;;  %v2623_v2 = vrot.slane %v1926_v61, %v2515_v28 }
 0x2b6   : > { %v276_v18 = vmul.f32 %v275_v17, %v275_v17 }
 0x2b8   : > { %v277_v20 = vadd.f32 1e-05, %v276_v18  ;;  %v1934_v18 = vld [vmem:[%s675_s4 + $0xc80] ss:$8 sm:$0xf] }
 0x2b9   : > { %v2655_v31 = vrot.slane %v1934_v18, %v2455_v6  ;;  %v2658_v32 = vrot.slane %v1934_v18, %v2458_v9  ;;  %v2661_v3 = vrot.slane %v1934_v18, %v2515_v28  ;;  %v2664_v37 = vrot.slane %v1934_v18, %v2518_v29 }
 0x2ba   : > { %2113 = vrsqrt.f32 %v277_v20  ;;  %v2629_v20 = vrot.slane %v1928_v62, %v2455_v6 }
 0x2bb   : > { %3279 = vst [vmem:[#allocation26_spill] sm:$0xff] %v2655_v31  ;;  %3280 = vst [vmem:[#allocation27_spill] sm:$0xff] %v2658_v32 }
 0x2bc   : > { %3281 = vst [vmem:[#allocation28_spill] sm:$0xff] %v2661_v3  ;;  %3282 = vst [vmem:[#allocation29_spill] sm:$0xff] %v2664_v37 }
 0x2c4   : > { %v2114_v21 = vpop.eup %2113 }
 0x2c5   : > { %v279_v23 = vmul.f32 %v2114_v21, %v275_v17  ;;  %v2626_v17 = vrot.slane %v1926_v61, %v2518_v29  ;;  %v2632_v21 = vrot.slane %v1928_v62, %v2458_v9 }
 0x2c7   : > { %v281_v25 = vmul.f32 %v280_v22, %v279_v23  ;;  %v2635_v22 = vrot.slane %v1928_v62, %v2515_v28  ;;  %v2638_v23 = vrot.slane %v1928_v62, %v2518_v29 }
 0x2c9   : > { %v2507_v26 = vadd.f32 %v282_v24, %v281_v25  ;;  %v2641_v24 = vrot.slane %v1932_v8, %v2455_v6  ;;  %v2644_v25 = vrot.slane %v1932_v8, %v2458_v9 }
 0x2cb   : > { %3273 = vst [vmem:[#allocation20_spill] sm:$0xff] %v2507_v26  ;;  %v287_v1 = vrot.slane %v2507_v26, %v2455_v6  ;;  %v294_v27 = vrot.slane %v2507_v26, %v2458_v9  ;;  %3276 = vst [vmem:[#allocation23_spill] sm:$0xff] %v2644_v25 }
 0x2cd   : > { %289 = vbcast.lane.b32.xlu1 %v287_v1, 256  ;;  %v2647_v1 = vrot.slane %v1932_v8, %v2515_v28 }
 0x2cf   : > { %3277 = vst [vmem:[#allocation24_spill] sm:$0xff] %v2647_v1 }
 0x2d1   : > { %296 = vbcast.lane.b32.xlu1 %v294_v27, 256  ;;  %v2650_v27 = vrot.slane %v1932_v8, %v2518_v29 }
 0x2d3   : > { %3278 = vst [vmem:[#allocation25_spill] sm:$0xff] %v2650_v27 }
 0x33f   : > { %v2652_v30 = vpop.permute.xlu1 %289 }
 0x340   : > { %v335_v42 = vmul.f32 %v2521_v33, %v2652_v30  ;;  %v336_v51 = vmul.f32 %v2524_v34, %v2652_v30  ;;  %v337_v56 = vmul.f32 %v2527_v35, %v2652_v30  ;;  %v338_v61 = vmul.f32 %v2530_v36, %v2652_v30 }
 0x341   : > { %v458_v62 = vmul.f32 %v2545_v43, %v2652_v30  ;;  %v459_v8 = vmul.f32 %v2548_v44, %v2652_v30  ;;  %v460_v18 = vmul.f32 %v2551_v45, %v2652_v30  ;;  %v461_v29 = vmul.f32 %v2554_v46, %v2652_v30 }
 0x342   : > { %v364_v28 = vadd.f32 %v2533_v38, %v335_v42  ;;  %v365_v19 = vadd.f32 %v2536_v39, %v336_v51  ;;  %v366_v9 = vadd.f32 %v2539_v40, %v337_v56  ;;  %v367_v6 = vadd.f32 %v2542_v41, %v338_v61 }
 0x343   : > { %v487_v0 = vadd.f32 %v2557_v47, %v458_v62  ;;  %v488_v26 = vadd.f32 %v2560_v48, %v459_v8  ;;  %v489_v10 = vadd.f32 %v2563_v49, %v460_v18  ;;  %v490_v37 = vadd.f32 %v2566_v50, %v461_v29  ;;  %v2690_v1 = vpop.permute.xlu1 %296 }
 0x344   : > { %v372_v3 = vmax.f32 %v364_v28, 0.0  ;;  %v373_v32 = vmax.f32 %v365_v19, 0.0  ;;  %v374_v31 = vmax.f32 %v366_v9, 0.0  ;;  %v375_v27 = vmax.f32 %v367_v6, 0.0 }
 0x345   : > { %v495_v42 = vmax.f32 %v487_v0, 0.0  ;;  %v496_v51 = vmax.f32 %v488_v26, 0.0  ;;  %v497_v25 = vmax.f32 %v489_v10, 0.0  ;;  %v498_v56 = vmax.f32 %v490_v37, 0.0 }
 0x346   : > { %v401_v61 = vmul.f32 %v2569_v52, %v372_v3  ;;  %v402_v62 = vmul.f32 %v2572_v53, %v373_v32  ;;  %v403_v8 = vmul.f32 %v2575_v54, %v374_v31  ;;  %v404_v18 = vmul.f32 %v2578_v55, %v375_v27 }
 0x347   : > { %v524_v29 = vmul.f32 %v2581_v57, %v495_v42  ;;  %v525_v19 = vmul.f32 %v2584_v58, %v496_v51  ;;  %v526_v6 = vmul.f32 %v2587_v59, %v497_v25  ;;  %v527_v9 = vmul.f32 %v2590_v60, %v498_v56 }
 0x348   : > { %v409_v0 = vadd.f32 %v402_v62, %v401_v61  ;;  %v339_v10 = vmul.f32 %v2521_v33, %v2690_v1  ;;  %v340_v26 = vmul.f32 %v2524_v34, %v2690_v1  ;;  %v341_v28 = vmul.f32 %v2527_v35, %v2690_v1 }
 0x349   : > { %v532_v31 = vadd.f32 %v525_v19, %v524_v29  ;;  %v342_v27 = vmul.f32 %v2530_v36, %v2690_v1  ;;  %v462_v32 = vmul.f32 %v2545_v43, %v2690_v1  ;;  %v463_v25 = vmul.f32 %v2548_v44, %v2690_v1 }
 0x34a   : > { %v410_v3 = vadd.f32 %v409_v0, %v403_v8  ;;  %v368_v37 = vadd.f32 %v2533_v38, %v339_v10  ;;  %v369_v33 = vadd.f32 %v2536_v39, %v340_v26  ;;  %v370_v34 = vadd.f32 %v2539_v40, %v341_v28 }
 0x34b   : > { %v533_v42 = vadd.f32 %v532_v31, %v526_v6  ;;  %v371_v35 = vadd.f32 %v2542_v41, %v342_v27  ;;  %v464_v51 = vmul.f32 %v2551_v45, %v2690_v1  ;;  %v465_v36 = vmul.f32 %v2554_v46, %v2690_v1 }
 0x34c   : > { %v411_v43 = vadd.f32 %v410_v3, %v404_v18  ;;  %v376_v56 = vmax.f32 %v368_v37, 0.0  ;;  %v377_v61 = vmax.f32 %v369_v33, 0.0  ;;  %v378_v44 = vmax.f32 %v370_v34, 0.0 }
 0x34d   : > { %v534_v62 = vadd.f32 %v533_v42, %v527_v9  ;;  %v379_v8 = vmax.f32 %v371_v35, 0.0  ;;  %v491_v38 = vadd.f32 %v2557_v47, %v462_v32  ;;  %v492_v39 = vadd.f32 %v2560_v48, %v463_v25 }
 0x34e   : > { %412 = vadd.xlane.f32.xlu0 %v411_v43  ;;  %v405_v40 = vmul.f32 %v2569_v52, %v376_v56  ;;  %v406_v41 = vmul.f32 %v2572_v53, %v377_v61  ;;  %v407_v45 = vmul.f32 %v2575_v54, %v378_v44  ;;  %v493_v29 = vadd.f32 %v2563_v49, %v464_v51 }
 0x34f   : > { %v408_v46 = vmul.f32 %v2578_v55, %v379_v8  ;;  %v494_v18 = vadd.f32 %v2566_v50, %v465_v36  ;;  %v499_v19 = vmax.f32 %v491_v38, 0.0  ;;  %v500_v6 = vmax.f32 %v492_v39, 0.0 }
 0x350   : > { %v414_v9 = vadd.f32 %v406_v41, %v405_v40  ;;  %v501_v0 = vmax.f32 %v493_v29, 0.0  ;;  %v581_v47 = vmul.f32 %v2593_v63, %v2652_v30  ;;  %v582_v48 = vmul.f32 %v2596_v4, %v2652_v30 }
 0x351   : > { %v502_v52 = vmax.f32 %v494_v18, 0.0  ;;  %v528_v53 = vmul.f32 %v2581_v57, %v499_v19  ;;  %v529_v54 = vmul.f32 %v2584_v58, %v500_v6  ;;  %v583_v49 = vmul.f32 %v2599_v5, %v2652_v30  ;;  %v3283_v19 = vld [vmem:[#allocation23_spill] sm:$0xff] }
 0x352   : > { %535 = vadd.xlane.f32.xlu0 %v534_v62  ;;  %v415_v50 = vadd.f32 %v414_v9, %v407_v45  ;;  %v530_v55 = vmul.f32 %v2587_v59, %v501_v0  ;;  %v584_v10 = vmul.f32 %v2602_v7, %v2652_v30  ;;  %v610_v26 = vadd.f32 %v2617_v15, %v581_v47  ;;  %v3284_v0 = vld [vmem:[#allocation24_spill] sm:$0xff] }
 0x353   : > { %v531_v28 = vmul.f32 %v2590_v60, %v502_v52  ;;  %v537_v31 = vadd.f32 %v529_v54, %v528_v53  ;;  %v611_v27 = vadd.f32 %v2620_v16, %v582_v48  ;;  %v612_v57 = vadd.f32 %v2623_v2, %v583_v49  ;;  %v3285_v48 = vld [vmem:[#allocation25_spill] sm:$0xff] }
 0x354   : > { %v416_v58 = vadd.f32 %v415_v50, %v408_v46  ;;  %v613_v32 = vadd.f32 %v2626_v17, %v584_v10  ;;  %v618_v25 = vmax.f32 %v610_v26, 0.0  ;;  %v585_v3 = vmul.f32 %v2593_v63, %v2690_v1  ;;  %v3287_v26 = vld [vmem:[#allocation27_spill] sm:$0xff] }
 0x355   : > { %v538_v59 = vadd.f32 %v537_v31, %v530_v55  ;;  %v619_v37 = vmax.f32 %v611_v27, 0.0  ;;  %v620_v33 = vmax.f32 %v612_v57, 0.0  ;;  %v586_v34 = vmul.f32 %v2596_v4, %v2690_v1 }
 0x356   : > { %417 = vadd.xlane.f32.xlu1 %v416_v58  ;;  %v621_v60 = vmax.f32 %v613_v32, 0.0  ;;  %v647_v42 = vmul.f32 %v2629_v20, %v618_v25  ;;  %v587_v35 = vmul.f32 %v2599_v5, %v2690_v1  ;;  %v588_v51 = vmul.f32 %v2602_v7, %v2690_v1 }
 0x357   : > { %v539_v36 = vadd.f32 %v538_v59, %v531_v28  ;;  %v648_v43 = vmul.f32 %v2632_v21, %v619_v37  ;;  %v649_v63 = vmul.f32 %v2635_v22, %v620_v33  ;;  %v614_v56 = vadd.f32 %v2617_v15, %v585_v3  ;;  %v3289_v33 = vld [vmem:[#allocation29_spill] sm:$0xff] }
 0x358   : > { %v650_v61 = vmul.f32 %v2638_v23, %v621_v60  ;;  %v615_v4 = vadd.f32 %v2620_v16, %v586_v34  ;;  %v616_v44 = vadd.f32 %v2623_v2, %v587_v35  ;;  %v617_v62 = vadd.f32 %v2626_v17, %v588_v51 }
 0x359   : > { %540 = vadd.xlane.f32.xlu0 %v539_v36  ;;  %v655_v5 = vadd.f32 %v648_v43, %v647_v42  ;;  %v622_v8 = vmax.f32 %v614_v56, 0.0  ;;  %v704_v7 = vmul.f32 %v2605_v11, %v2652_v30  ;;  %v705_v38 = vmul.f32 %v2608_v12, %v2652_v30 }
 0x35a   : > { %v623_v39 = vmax.f32 %v615_v4, 0.0  ;;  %v624_v40 = vmax.f32 %v616_v44, 0.0  ;;  %v625_v15 = vmax.f32 %v617_v62, 0.0  ;;  %v706_v41 = vmul.f32 %v2611_v13, %v2652_v30 }
 0x35b   : > { %v656_v16 = vadd.f32 %v655_v5, %v649_v63  ;;  %v651_v2 = vmul.f32 %v2629_v20, %v622_v8  ;;  %v707_v17 = vmul.f32 %v2614_v14, %v2652_v30  ;;  %v733_v45 = vadd.f32 %v2641_v24, %v704_v7 }
 0x35c   : > { %v652_v29 = vmul.f32 %v2632_v21, %v623_v39  ;;  %v653_v46 = vmul.f32 %v2635_v22, %v624_v40  ;;  %v654_v18 = vmul.f32 %v2638_v23, %v625_v15  ;;  %v734_v6 = vadd.f32 %v3283_v19, %v705_v38  ;;  %v3286_v23 = vld [vmem:[#allocation26_spill] sm:$0xff] }
 0x35d   : > { %v657_v9 = vadd.f32 %v656_v16, %v650_v61  ;;  %v735_v47 = vadd.f32 %v3284_v0, %v706_v41  ;;  %v736_v52 = vadd.f32 %v3285_v48, %v707_v17  ;;  %v741_v53 = vmax.f32 %v733_v45, 0.0 }
 0x35e   : > { %v660_v20 = vadd.f32 %v652_v29, %v651_v2  ;;  %v742_v54 = vmax.f32 %v734_v6, 0.0  ;;  %v708_v30 = vmul.f32 %v2605_v11, %v2690_v1  ;;  %v709_v21 = vmul.f32 %v2608_v12, %v2690_v1  ;;  %v3288_v11 = vld [vmem:[#allocation28_spill] sm:$0xff]  ;;  %v3290_v29 = vld [vmem:[#allocation19_spill] sm:$0xff] }
 0x35f   : > { %658 = vadd.xlane.f32.xlu0 %v657_v9  ;;  %v743_v22 = vmax.f32 %v735_v47, 0.0  ;;  %v744_v49 = vmax.f32 %v736_v52, 0.0  ;;  %v770_v50 = vmul.f32 %v3286_v23, %v741_v53  ;;  %v710_v55 = vmul.f32 %v2611_v13, %v2690_v1  ;;  %v3291_v6 = vld [vmem:[#allocation20_spill] sm:$0xff] }
 0x360   : > { %v661_v10 = vadd.f32 %v660_v20, %v653_v46  ;;  %v771_v28 = vmul.f32 %v3287_v26, %v742_v54  ;;  %v711_v31 = vmul.f32 %v2614_v14, %v2690_v1  ;;  %v737_v27 = vadd.f32 %v2641_v24, %v708_v30 }
 0x361   : > { %v772_v57 = vmul.f32 %v3288_v11, %v743_v22  ;;  %v738_v12 = vadd.f32 %v3283_v19, %v709_v21  ;;  %v739_v58 = vadd.f32 %v3284_v0, %v710_v55  ;;  %v773_v34 = vmul.f32 %v3289_v33, %v744_v49 }
 0x362   : > { %v662_v32 = vadd.f32 %v661_v10, %v654_v18  ;;  %v778_v25 = vadd.f32 %v771_v28, %v770_v50  ;;  %v740_v3 = vadd.f32 %v3285_v48, %v711_v31  ;;  %v745_v59 = vmax.f32 %v737_v27, 0.0  ;;  %v3294_v27 = vld [vmem:[#allocation15_spill] sm:$0xff] (%p70_p8) }
 0x363   : > { %v746_v13 = vmax.f32 %v738_v12, 0.0  ;;  %v747_v37 = vmax.f32 %v739_v58, 0.0  ;;  %v790_v15 = vstv %s111_s23  ;;  %v811_v53 = vstv %s123_s1 }
 0x364   : > { %663 = vadd.xlane.f32.xlu0 %v662_v32  ;;  %v779_v14 = vadd.f32 %v778_v25, %v772_v57  ;;  %v774_v24 = vmul.f32 %v3286_v23, %v745_v59  ;;  %v748_v1 = vmax.f32 %v740_v3, 0.0  ;;  %v813_v54 = vstv %s127_s30 }
 0x365   : > { %v775_v60 = vmul.f32 %v3287_v26, %v746_v13  ;;  %v776_v35 = vmul.f32 %v3288_v11, %v747_v37  ;;  %v822_v55 = vstv (%p70_p8), %s815_s24  ;;  %v824_v26 = vstv (%p70_p8), %s1935_s25 }
 0x366   : > { %v780_v42 = vadd.f32 %v779_v14, %v773_v34  ;;  %v777_v36 = vmul.f32 %v3289_v33, %v748_v1 }
 0x367   : > { %v783_v51 = vadd.f32 %v775_v60, %v774_v24 }
 0x368   : > { %781 = vadd.xlane.f32.xlu0 %v780_v42 }
 0x369   : > { %v784_v43 = vadd.f32 %v783_v51, %v776_v35 }
 0x36b   : > { %v785_v63 = vadd.f32 %v784_v43, %v777_v36 }
 0x36d   : > { %786 = vadd.xlane.f32.xlu0 %v785_v63 }
 0x3db   : > { %v413_v56 = vpop.xlane.xlu0 %412 }
 0x3df   : > { %v536_v61 = vpop.xlane.xlu0 %535 }
 0x3e0   : > { %v542_v5 = vadd.f32 %v536_v61, %v413_v56 }
 0x3e3   : > { %v418_v38 = vpop.xlane.xlu1 %417 }
 0x3e6   : > { %v541_v4 = vpop.xlane.xlu0 %540 }
 0x3e7   : > { %v543_v39 = vadd.f32 %v541_v4, %v418_v38 }
 0x3ec   : > { %v659_v44 = vpop.xlane.xlu0 %658 }
 0x3ed   : > { %v665_v8 = vadd.f32 %v659_v44, %v542_v5 }
 0x3f1   : > { %v664_v62 = vpop.xlane.xlu0 %663 }
 0x3f2   : > { %v666_v41 = vadd.f32 %v664_v62, %v543_v39 }
 0x3f5   : > { %v782_v7 = vpop.xlane.xlu0 %781 }
 0x3f6   : > { %v788_v40 = vadd.f32 %v782_v7, %v665_v8 }
 0x3f8   : > { %v791_v2 = vadd.f32 %v790_v15, %v788_v40 }
 0x3fa   : > { %v787_v16 = vpop.xlane.xlu0 %786  ;;  %v798_v46 = vrot.slane %v791_v2, %v3290_v29 }
 0x3fb   : > { %v789_v17 = vadd.f32 %v787_v16, %v666_v41 }
 0x3fd   : > { %v792_v45 = vadd.f32 %v790_v15, %v789_v17 }
 0x3ff   : > { %v802_v18 = vrot.slane %v792_v45, %v3290_v29 }
 0x401   : > { %v803_v19 = vsel %vm271_vm1, %v802_v18, %v798_v46 }
 0x402   : > { %v805_v9 = vadd.f32 %v803_v19, %v3291_v6 }
 0x404   : > { %v806_v0 = vsub.f32 %v805_v9, %v805_v9 }
 0x406   : > { %v807_v47 = vmul.f32 %v806_v0, %v806_v0 }
 0x408   : > { %v808_v48 = vadd.f32 1e-05, %v807_v47 }
 0x40a   : > { %2115 = vrsqrt.f32 %v808_v48 }
 0x414   : > { %v2116_v52 = vpop.eup %2115 }
 0x415   : > { %v810_v20 = vmul.f32 %v2116_v52, %v806_v0  ;;  %72 = sbr.rel (!%p70_p8) target bundleno = 88 (0x58), region = 82 }
 0x417   : > { %v812_v30 = vmul.f32 %v811_v53, %v810_v20 }
 0x419   : > { %v814_v21 = vadd.f32 %v813_v54, %v812_v30  }
 0x41b   : > { %v3292_v1 = vmov %v814_v21  ;;  %v817_v22 = vsub.f32 (%p70_p8), %v814_v21, %v814_v21 }
 0x41d   :  { %v818_v49 = vmul.f32 %v817_v22, %v817_v22 }
 0x41f   :  { %v819_v23 = vadd.f32 1e-05, %v818_v49 }
 0x421   :  { %2117 = vrsqrt.f32 %v819_v23 }
 0x42b   :  { %v2118_v50 = vpop.eup %2117 }
 0x42c   :  { %v821_v10 = vmul.f32 %v2118_v50, %v817_v22 }
 0x42e   :  { %v823_v28 = vmul.f32 %v822_v55, %v821_v10 }
 0x430   :  { %v2811_v31 = vadd.f32 %v824_v26, %v823_v28 }
 0x432   :  { %3293 = vst [vmem:[#allocation30_spill] sm:$0xff] %v2811_v31 }
 0x433 LB: > { %s833_s3 = sld [smem:[#allocation5 + %s2285_s8]]  ;;  %s834_s9 = sshra.s32 %s2285_s8, 7  ;;  %v3296_v32 = vld [vmem:[#allocation16_spill] sm:$0xff]  ;;  %v3297_v3 = vld [vmem:[#allocation17_spill] sm:$0xff]  ;;  %v3298_v14 = vld [vmem:[#allocation18_spill] sm:$0xff]  ;;  %v2281_v27 = vphi %v3294_v27, %v3313_v27   ;;  %s2285_s8 = sphi %s2816_s8, %s831_s8  }
 0x434   : > { %s2826_s10 = sshll.u32 %s834_s9, 7  ;;  %s2829_s11 = sand.u32 127, %s2285_s8 }
 0x435   : > { %s2019_s12 = sadd.s32 384, %s2826_s10  ;;  %s2015_s14 = sadd.s32 128, %s2826_s10 }
 0x436   : > { %s848_s13 = sadd.s32 %s2019_s12, %s2829_s11  ;;  %s840_s15 = sadd.s32 %s2015_s14, %s2829_s11 }
 0x437   : > { %s849_s5 = sld [smem:[#allocation5 + %s848_s13]]  ;;  %s2021_s2 = sadd.s32 512, %s2826_s10 }
 0x438   : > { %s841_s16 = sld [smem:[#allocation5 + %s840_s15]]  ;;  %s852_s17 = sadd.s32 %s2021_s2, %s2829_s11 }
 0x439   : > { %v3295_v31 = vld [vmem:[#allocation30_spill] sm:$0xff]  ;;  %v926_v11 = vstv %s833_s3  ;;  %s853_s18 = sld [smem:[#allocation5 + %s852_s17]]  ;;  %s2017_s19 = sadd.s32 256, %s2826_s10 }
 0x43a   : > { %v927_v57 = vmul.f32 %v2281_v27, %v926_v11  ;;  %s844_s20 = sadd.s32 %s2017_s19, %s2829_s11  ;;  %s2023_s0 = sadd.s32 640, %s2826_s10 }
 0x43b   : > { %s845_s21 = sld [smem:[#allocation5 + %s844_s20]]  ;;  %s856_s4 = sadd.s32 %s2023_s0, %s2829_s11 }
 0x43c   : > { %s857_s22 = sld [smem:[#allocation5 + %s856_s4]]  ;;  %s2025_s6 = sadd.s32 768, %s2826_s10 }
 0x43d   : > { %v928_v12 = vstv %s849_s5  ;;  %s860_s23 = sadd.s32 %s2025_s6, %s2829_s11  ;;  %s2027_s26 = sadd.s32 896, %s2826_s10 }
 0x43e   : > { %v929_v58 = vadd.f32 %v928_v12, %v927_v57  ;;  %v930_v13 = vstv %s841_s16  ;;  %s861_s27 = sld [smem:[#allocation5 + %s860_s23]]  ;;  %s864_s28 = sadd.s32 %s2027_s26, %s2829_s11  ;;  %v3299_v57 = vld [vmem:[#allocation19_spill] sm:$0xff] }
 0x43f   : > { %v931_v37 = vmul.f32 %v2281_v27, %v930_v13  ;;  %v932_v33 = vstv %s853_s18  ;;  %s865_s29 = sld [smem:[#allocation5 + %s864_s28]]  ;;  %s2047_s1 = sadd.s32 2176, %s2826_s10 }
 0x440   : > { %v941_v25 = vrot.slane %v929_v58, %v3296_v32  ;;  %v948_v59 = vrot.slane %v929_v58, %v3297_v3  ;;  %s2049_s30 = sadd.s32 2304, %s2826_s10  ;;  %s904_s24 = sadd.s32 %s2047_s1, %s2829_s11 }
 0x441   : > { %v933_v34 = vadd.f32 %v932_v33, %v931_v37  ;;  %v934_v16 = vstv %s845_s21  ;;  %s2029_s25 = sadd.s32 1024, %s2826_s10  ;;  %s908_s3 = sadd.s32 %s2049_s30, %s2829_s11 }
 0x442   : > { %943 = vbcast.lane.b32.xlu0 %v941_v25, 256  ;;  %v935_v2 = vmul.f32 %v2281_v27, %v934_v16  ;;  %v936_v17 = vstv %s857_s22  ;;  %s2035_s9 = sadd.s32 1408, %s2826_s10  ;;  %s905_s12 = sld [smem:[#allocation5 + %s904_s24]] }
 0x443   : > { %v959_v24 = vrot.slane %v933_v34, %v3298_v14  ;;  %s868_s13 = sadd.s32 %s2029_s25, %s2829_s11  ;;  %s909_s5 = sld [smem:[#allocation5 + %s908_s3]] }
 0x444   : > { %v937_v45 = vadd.f32 %v936_v17, %v935_v2  ;;  %v1051_v49 = vstv %s861_s27  ;;  %s880_s14 = sadd.s32 %s2035_s9, %s2829_s11  ;;  %s869_s15 = sld [smem:[#allocation5 + %s868_s13]] }
 0x445   : > { %v967_v1 = vrot.slane %v959_v24, %v3298_v14  ;;  %v960_v60 = vcombine.high %v959_v24, %v959_v24  ;;  %v1054_v55 = vstv %s865_s29  ;;  %s881_s2 = sld [smem:[#allocation5 + %s880_s14]]  ;;  %s2031_s16 = sadd.s32 1152, %s2826_s10 }
 0x446   : > { %950 = vbcast.lane.b32.xlu0 %v948_v59, 256  ;;  %v1017_v46 = vrot.slane %v937_v45, %v3298_v14  ;;  %s872_s17 = sadd.s32 %s2031_s16, %s2829_s11  ;;  %s2037_s18 = sadd.s32 1536, %s2826_s10 }
 0x447   : > { %v978_v42 = vrot.slane %v967_v1, %v3296_v32  ;;  %v974_v35 = vrot.slane %v960_v60, %v3298_v14  ;;  %s873_s19 = sld [smem:[#allocation5 + %s872_s17]]  ;;  %s884_s20 = sadd.s32 %s2037_s18, %s2829_s11 }
 0x448   : > { %v1025_v19 = vrot.slane %v1017_v46, %v3298_v14  ;;  %v1018_v6 = vcombine.high %v1017_v46, %v1017_v46  ;;  %s885_s0 = sld [smem:[#allocation5 + %s884_s20]]  ;;  %s2033_s21 = sadd.s32 1280, %s2826_s10 }
 0x449   : > { %v982_v43 = vrot.slane %v974_v35, %v3296_v32  ;;  %v1080_v1 = vstv %s909_s5  ;;  %s876_s4 = sadd.s32 %s2033_s21, %s2829_s11  ;;  %s2039_s22 = sadd.s32 1664, %s2826_s10 }
 0x44a   : > { %v1036_v9 = vrot.slane %v1025_v19, %v3296_v32  ;;  %v1032_v0 = vrot.slane %v1018_v6, %v3298_v14  ;;  %s877_s6 = sld [smem:[#allocation5 + %s876_s4]]  ;;  %s888_s23 = sadd.s32 %s2039_s22, %s2829_s11 }
 0x44b   : > { %s889_s26 = sld [smem:[#allocation5 + %s888_s23]]  ;;  %s2041_s27 = sadd.s32 1792, %s2826_s10 }
 0x44c   : > { %v1040_v53 = vrot.slane %v1032_v0, %v3296_v32  ;;  %s892_s28 = sadd.s32 %s2041_s27, %s2829_s11  ;;  %s2043_s29 = sadd.s32 1920, %s2826_s10 }
 0x44d   : > { %s893_s1 = sld [smem:[#allocation5 + %s892_s28]]  ;;  %s896_s30 = sadd.s32 %s2043_s29, %s2829_s11 }
 0x44e   : > { %s897_s24 = sld [smem:[#allocation5 + %s896_s30]]  ;;  %s2051_s25 = sadd.s32 2432, %s2826_s10 }
 0x44f   : > { %s2053_s3 = sadd.s32 2560, %s2826_s10  ;;  %s912_s9 = sadd.s32 %s2051_s25, %s2829_s11 }
 0x450   : > { %s913_s13 = sld [smem:[#allocation5 + %s912_s9]]  ;;  %s1958_s14 = sshll.u32 %s2285_s8, 2 }
 0x451   : > { %s1371_s17 = sadd.s32 1, %s1958_s14  ;;  %s1252_s18 = sand.u32 7, %s1958_s14 }
 0x452   : > { %s1372_s21 = sshra.s32 %s1371_s17, 3  ;;  %s1494_s4 = sadd.s32 2, %s1958_s14 }
 0x453   : > { %s1375_s23 = sand.u32 7, %s1371_s17  ;;  %s1495_s27 = sshra.s32 %s1494_s4, 3 }
 0x454   : > { %s1498_s29 = sand.u32 7, %s1494_s4  ;;  %s831_s8 = sadd.s32 1, %s2285_s8  }
 0x455   : > { %p828_p9 = scmp.ge.s32.totalorder %s831_s8, 100  }
 0x456   :  { %s2297_s8 = smov (%p828_p9), 121   ;;  %vm1786_vm2 = vcmask (%p828_p9), 1024  }
 0x4b4   : > { %v944_v51 = vpop.permute.xlu0 %943 }
 0x4b5   : > { %v985_v36 = vmul.f32 %v978_v42, %v944_v51  ;;  %v1082_v42 = vstv %s869_s15  ;;  %v1084_v51 = vstv %s881_s2  ;;  %s1617_s15 = sadd.s32 3, %s1958_s14  ;;  %s1249_s2 = sshra.s32 %s1958_s14, 3 }
 0x4b6   : > { %s1618_s16 = sshra.s32 %s1617_s15, 3  ;;  %s1621_s20 = sand.u32 7, %s1617_s15 }
 0x4b7   : > { %v988_v63 = vsel %vm189_vm0, %v985_v36, -inf  ;;  %s2055_s14 = sadd.s32 2688, %s2826_s10  ;;  %s2057_s15 = sadd.s32 2816, %s2826_s10 }
 0x4b8   : > { %989 = vmax.xlane.f32.xlu1 %v988_v63  ;;  %v951_v56 = vpop.permute.xlu0 %950 }
 0x4b9   : > { %v986_v61 = vmul.f32 %v982_v43, %v951_v56 }
 0x4bb   : > { %v991_v4 = vsel %vm189_vm0, %v986_v61, -inf }
 0x4bc   : > { %992 = vmax.xlane.f32.xlu1 %v991_v4 }
 0x545   : > { %v990_v44 = vpop.xlane.xlu1 %989 }
 0x546   : > { %v994_v62 = vsub.f32 %v985_v36, %v990_v44  ;;  %v1088_v44 = vstv %s885_s0  ;;  %s2061_s0 = sshll.u32 %s1618_s16, 5  ;;  %s924_s16 = sadd.s32 %s2057_s15, %s2829_s11 }
 0x548   : > { %v996_v5 = vmul.f32 1.442695, %v994_v62 }
 0x549   : > { %v993_v8 = vpop.xlane.xlu1 %992 }
 0x54a   : > { %2119 = vpow2.f32 %v996_v5  ;;  %v995_v7 = vsub.f32 %v986_v61, %v993_v8  ;;  %v1086_v61 = vstv %s873_s19  ;;  %s2058_s19 = sshll.u32 %s1249_s2, 5  ;;  %s920_s2 = sadd.s32 %s2055_s14, %s2829_s11 }
 0x54b   : > { %v1087_v4 = vmul.f32 %v1086_v61, %v3295_v31  ;;  %s1255_s22 = sadd.s32 %s2058_s19, %s1252_s18  ;;  %s921_s17 = sld [smem:[#allocation5 + %s920_s2]] }
 0x54c   : > { %v998_v38 = vmul.f32 1.442695, %v995_v7  ;;  %s1256_s30 = scalar_lea.vmem [#allocation11], %s1255_s22  ;;  %s925_s18 = sld [smem:[#allocation5 + %s924_s16]] }
 0x54d   : > { %v1089_v62 = vadd.f32 %v1088_v44, %v1087_v4  ;;  %s1984_s19 = sld [smem:[#allocation6 + $0x2]] (%p828_p9) }
 0x54e   : > { %2121 = vpow2.f32 %v998_v38 }
 0x54f   : > { %v1115_v5 = vrot.slane %v1089_v62, %v3298_v14 }
 0x551   : > { %v1123_v8 = vrot.slane %v1115_v5, %v3298_v14  ;;  %v1116_v7 = vcombine.high %v1115_v5, %v1115_v5  ;;  %v1230_v5 = vstv %s913_s13 }
 0x553   : > { %v1134_v38 = vrot.slane %v1123_v8, %v3296_v32 }
 0x554   : > { %v2120_v39 = vpop.eup %2119 }
 0x555   : > { %v1000_v40 = vsel %vm189_vm0, %v2120_v39, 0.0 }
 0x556   : > { %1001 = vadd.xlane.f32.xlu0 %v1000_v40 }
 0x558   : > { %v2122_v15 = vpop.eup %2121 }
 0x559   : > { %v1003_v41 = vsel %vm189_vm0, %v2122_v15, 0.0 }
 0x55a   : > { %1004 = vadd.xlane.f32.xlu1 %v1003_v41 }
 0x5e3   : > { %v1002_v29 = vpop.xlane.xlu0 %1001 }
 0x5e4   : > { %2123 = vrcp.f32 %v1002_v29 }
 0x5e7   : > { %v1005_v18 = vpop.xlane.xlu1 %1004 }
 0x5e8   : > { %2125 = vrcp.f32 %v1005_v18 }
 0x5ee   : > { %v2124_v47 = vpop.eup %2123 }
 0x5ef   : > { %v1007_v48 = vmul.f32 %v2124_v47, %v2120_v39  ;;  %v1130_v39 = vrot.slane %v1116_v7, %v3298_v14 }
 0x5f1   : > { %v1043_v52 = vmul.f32 %v1036_v9, %v1007_v48  ;;  %v1138_v41 = vrot.slane %v1130_v39, %v3296_v32 }
 0x5f2   : > { %v2126_v20 = vpop.eup %2125 }
 0x5f3   : > { %v1045_v54 = vsel %vm189_vm0, %v1043_v52, 0.0  ;;  %v1009_v30 = vmul.f32 %v2126_v20, %v2122_v15 }
 0x5f4   : > { %1046 = vadd.xlane.f32.xlu1 %v1045_v54  ;;  %v1092_v54 = vstv %s889_s26  ;;  %s2059_s26 = sshll.u32 %s1372_s21, 5 }
 0x5f5   : > { %v1044_v21 = vmul.f32 %v1040_v53, %v1009_v30  ;;  %v1090_v53 = vstv %s877_s6  ;;  %s1624_s6 = sadd.s32 %s2061_s0, %s1621_s20  ;;  %s1378_s28 = sadd.s32 %s2059_s26, %s1375_s23 }
 0x5f6   : > { %v1091_v20 = vmul.f32 %v1090_v53, %v3295_v31  ;;  %s1985_s20 = sld [smem:[#allocation6 + $0x3]] (%p828_p9) }
 0x5f7   : > { %v1048_v22 = vsel %vm189_vm0, %v1044_v21, 0.0 }
 0x5f8   : > { %1049 = vadd.xlane.f32.xlu1 %v1048_v22  ;;  %v1093_v30 = vadd.f32 %v1092_v54, %v1091_v20 }
 0x5fa   : > { %v1172_v22 = vrot.slane %v1093_v30, %v3298_v14 }
 0x681   : > { %v1047_v23 = vpop.xlane.xlu1 %1046 }
 0x682   : > { %v1052_v50 = vmul.f32 %v1051_v49, %v1047_v23  ;;  %v1180_v23 = vrot.slane %v1172_v22, %v3298_v14 }
 0x684   : > { %v1055_v26 = vadd.f32 %v1054_v55, %v1052_v50  ;;  %v1173_v50 = vcombine.high %v1172_v22, %v1172_v22 }
 0x685   : > { %v1050_v10 = vpop.xlane.xlu1 %1049 }
 0x686   : > { %v1053_v28 = vmul.f32 %v1051_v49, %v1050_v10  ;;  %v1064_v12 = vrot.slane %v1055_v26, %v3299_v57  ;;  %v1187_v10 = vrot.slane %v1173_v50, %v3298_v14 }
 0x688   : > { %v1056_v11 = vadd.f32 %v1054_v55, %v1053_v28  ;;  %v1191_v55 = vrot.slane %v1180_v23, %v3296_v32 }
 0x68a   : > { %v1068_v58 = vrot.slane %v1056_v11, %v3299_v57 }
 0x68c   : > { %v1070_v25 = vsel %vm271_vm1, %v1068_v58, %v1064_v12  ;;  %v1195_v12 = vrot.slane %v1187_v10, %v3296_v32 }
 0x68d   : > { %v1072_v59 = vadd.f32 %v2281_v27, %v1070_v25  ;;  %v1078_v27 = vstv %s905_s12  ;;  %s916_s12 = sadd.s32 %s2053_s3, %s2829_s11  ;;  %s1379_s3 = scalar_lea.vmem [#allocation11], %s1378_s28 }
 0x68e   : > { %s917_s5 = sld [smem:[#allocation5 + %s916_s12]]  ;;  %v1968_v50 = vld [vmem:[%s1379_s3 + $0x640] ss:$8 sm:$0xf]  ;;  %s2045_s12 = sadd.s32 2048, %s2826_s10 }
 0x68f   : > { %v1073_v13 = vsub.f32 %v1072_v59, %v1072_v59  ;;  %s900_s13 = sadd.s32 %s2045_s12, %s2829_s11  ;;  %s1765_s10 = sld [smem:[#allocation6]] (%p828_p9) }
 0x690   :  { %s1983_s11 = sld [smem:[#allocation6 + $0x1]] (%p828_p9) }
 0x691   : > { %v1074_v37 = vmul.f32 %v1073_v13, %v1073_v13 }
 0x693   : > { %v1075_v33 = vadd.f32 1e-05, %v1074_v37 }
 0x694   : > { %v1232_v7 = vstv %s917_s5  ;;  %s901_s5 = sld [smem:[#allocation5 + %s900_s13]] }
 0x695   : > { %2127 = vrsqrt.f32 %v1075_v33  ;;  %v1206_v33 = vstv %s893_s1  ;;  %s2060_s1 = sshll.u32 %s1495_s27, 5 }
 0x696   : > { %s2928_s25 = sadd.s32 %s2060_s1, %s1498_s29 }
 0x697   : > { %s1502_s9 = scalar_lea.vmem [#allocation11], %s2928_s25 }
 0x69f   : > { %v2128_v34 = vpop.eup %2127 }
 0x6a0   : > { %v1077_v24 = vmul.f32 %v2128_v34, %v1073_v13 }
 0x6a2   : > { %v1079_v60 = vmul.f32 %v1078_v27, %v1077_v24  ;;  %v1209_v24 = vstv %s897_s24  ;;  %s1625_s24 = scalar_lea.vmem [#allocation11], %s1624_s6 }
 0x6a4   : > { %v2878_v35 = vadd.f32 %v1080_v1, %v1079_v60 }
 0x6a6   : > { %v1083_v36 = vmul.f32 %v1082_v42, %v2878_v35 }
 0x6a8   : > { %v1085_v43 = vadd.f32 %v1084_v51, %v1083_v36 }
 0x6aa   : > { %v1097_v63 = vrot.slane %v1085_v43, %v3296_v32  ;;  %v1104_v56 = vrot.slane %v1085_v43, %v3297_v3 }
 0x6ac   : > { %1099 = vbcast.lane.b32.xlu1 %v1097_v63, 256 }
 0x6b0   : > { %1106 = vbcast.lane.b32.xlu1 %v1104_v56, 256 }
 0x71e   : > { %v1100_v40 = vpop.permute.xlu1 %1099 }
 0x71f   : > { %v1141_v15 = vmul.f32 %v1134_v38, %v1100_v40 }
 0x721   : > { %v1143_v16 = vsel %vm189_vm0, %v1141_v15, -inf }
 0x722   : > { %1144 = vmax.xlane.f32.xlu0 %v1143_v16  ;;  %v1107_v2 = vpop.permute.xlu1 %1106  ;;  %v1626_v16 = vld [vmem:[%s1625_s24] ss:$8 sm:$0xf] }
 0x723   : > { %v1142_v17 = vmul.f32 %v1138_v41, %v1107_v2  ;;  %v1962_v41 = vld [vmem:[%s1256_s30 + $0x640] ss:$8 sm:$0xf]  ;;  %v2955_v53 = vrot.slane %v1626_v16, %v3296_v32  ;;  %v2958_v20 = vrot.slane %v1626_v16, %v3297_v3 }
 0x724   : > { %v1964_v2 = vld [vmem:[%s1256_s30 + $0xc80] ss:$8 sm:$0xf] }
 0x725   : > { %v1146_v45 = vsel %vm189_vm0, %v1142_v17, -inf  ;;  %v2970_v22 = vrot.slane %v1964_v2, %v3297_v3 }
 0x726   : > { %1147 = vmax.xlane.f32.xlu1 %v1146_v45 }
 0x7af   : > { %v1145_v29 = vpop.xlane.xlu0 %1144 }
 0x7b0   : > { %v1149_v46 = vsub.f32 %v1141_v15, %v1145_v29  ;;  %v1257_v15 = vld [vmem:[%s1256_s30] ss:$8 sm:$0xf] }
 0x7b1   : > { %v2934_v45 = vrot.slane %v1257_v15, %v3297_v3  ;;  %v3301_v29 = vld [vmem:[#allocation21_spill] sm:$0xff] }
 0x7b2   : > { %v1151_v18 = vmul.f32 1.442695, %v1149_v46  ;;  %v2937_v46 = vrot.slane %v1257_v15, %v3301_v29  ;;  %v2961_v54 = vrot.slane %v1626_v16, %v3301_v29 }
 0x7b3   : > { %v1148_v19 = vpop.xlane.xlu1 %1147 }
 0x7b4   : > { %2129 = vpow2.f32 %v1151_v18  ;;  %v1150_v6 = vsub.f32 %v1142_v17, %v1148_v19  ;;  %v2931_v17 = vrot.slane %v1257_v15, %v3296_v32  ;;  %v3302_v18 = vld [vmem:[#allocation22_spill] sm:$0xff] }
 0x7b5   : > { %v2940_v19 = vrot.slane %v1257_v15, %v3302_v18  ;;  %v2964_v30 = vrot.slane %v1626_v16, %v3302_v18  ;;  %v2976_v23 = vrot.slane %v1964_v2, %v3302_v18 }
 0x7b6   : > { %v1153_v9 = vmul.f32 1.442695, %v1150_v6  ;;  %v2943_v6 = vrot.slane %v1962_v41, %v3296_v32 }
 0x7b8   : > { %2131 = vpow2.f32 %v1153_v9  ;;  %v2946_v9 = vrot.slane %v1962_v41, %v3297_v3 }
 0x7be   : > { %v2130_v0 = vpop.eup %2129 }
 0x7bf   : > { %v1155_v47 = vsel %vm189_vm0, %v2130_v0, 0.0 }
 0x7c0   : > { %1156 = vadd.xlane.f32.xlu0 %v1155_v47  ;;  %v2952_v47 = vrot.slane %v1962_v41, %v3302_v18 }
 0x7c2   : > { %v2132_v48 = vpop.eup %2131 }
 0x7c3   : > { %v1158_v52 = vsel %vm189_vm0, %v2132_v48, 0.0 }
 0x7c4   : > { %1159 = vadd.xlane.f32.xlu0 %v1158_v52  ;;  %v1980_v52 = vld [vmem:[%s1625_s24 + $0x640] ss:$8 sm:$0xf] }
 0x84d   : > { %v1157_v21 = vpop.xlane.xlu0 %1156 }
 0x84e   : > { %2133 = vrcp.f32 %v1157_v21  ;;  %v2967_v21 = vrot.slane %v1964_v2, %v3296_v32 }
 0x851   : > { %v1160_v49 = vpop.xlane.xlu0 %1159 }
 0x852   : > { %2135 = vrcp.f32 %v1160_v49  ;;  %v2973_v49 = vrot.slane %v1964_v2, %v3301_v29 }
 0x858   : > { %v2134_v26 = vpop.eup %2133 }
 0x859   : > { %v1162_v28 = vmul.f32 %v2134_v26, %v2130_v0  ;;  %v2949_v0 = vrot.slane %v1962_v41, %v3301_v29 }
 0x85b   : > { %v1198_v11 = vmul.f32 %v1191_v55, %v1162_v28  ;;  %v1982_v55 = vld [vmem:[%s1625_s24 + $0xc80] ss:$8 sm:$0xf] }
 0x85c   : > { %v2136_v58 = vpop.eup %2135 }
 0x85d   : > { %v1200_v25 = vsel %vm189_vm0, %v1198_v11, 0.0  ;;  %v1164_v59 = vmul.f32 %v2136_v58, %v2132_v48  ;;  %v1380_v48 = vld [vmem:[%s1379_s3] ss:$8 sm:$0xf]  ;;  %v2994_v58 = vrot.slane %v1980_v52, %v3297_v3 }
 0x85e   : > { %1201 = vadd.xlane.f32.xlu0 %v1200_v25  ;;  %v2979_v10 = vrot.slane %v1380_v48, %v3296_v32  ;;  %v2982_v26 = vrot.slane %v1380_v48, %v3297_v3  ;;  %v2985_v28 = vrot.slane %v1380_v48, %v3301_v29  ;;  %v2988_v11 = vrot.slane %v1380_v48, %v3302_v18 }
 0x85f   : > { %v1199_v13 = vmul.f32 %v1195_v12, %v1164_v59  ;;  %v2991_v12 = vrot.slane %v1980_v52, %v3296_v32  ;;  %v2997_v25 = vrot.slane %v1980_v52, %v3301_v29  ;;  %v3000_v59 = vrot.slane %v1980_v52, %v3302_v18 }
 0x861   : > { %v1203_v37 = vsel %vm189_vm0, %v1199_v13, 0.0  ;;  %v1503_v13 = vld [vmem:[%s1502_s9] ss:$8 sm:$0xf] }
 0x862   : > { %1204 = vadd.xlane.f32.xlu0 %v1203_v37  ;;  %v1970_v37 = vld [vmem:[%s1379_s3 + $0xc80] ss:$8 sm:$0xf] }
 0x8eb   : > { %v1202_v34 = vpop.xlane.xlu0 %1201 }
 0x8ec   : > { %v1207_v27 = vmul.f32 %v1206_v33, %v1202_v34  ;;  %v3007_v34 = vrot.slane %v1968_v50, %v3297_v3 }
 0x8ee   : > { %v1210_v60 = vadd.f32 %v1209_v24, %v1207_v27  ;;  %v3010_v27 = vrot.slane %v1968_v50, %v3301_v29 }
 0x8ef   : > { %v1205_v1 = vpop.xlane.xlu0 %1204 }
 0x8f0   : > { %v1208_v42 = vmul.f32 %v1206_v33, %v1205_v1  ;;  %v1217_v36 = vrot.slane %v1210_v60, %v3299_v57  ;;  %v3004_v33 = vrot.slane %v1968_v50, %v3296_v32  ;;  %v3016_v1 = vrot.slane %v1982_v55, %v3296_v32 }
 0x8f1   : > { %v3019_v60 = vrot.slane %v1982_v55, %v3297_v3 }
 0x8f2   : > { %v1211_v51 = vadd.f32 %v1209_v24, %v1208_v42  ;;  %v3013_v24 = vrot.slane %v1968_v50, %v3302_v18  ;;  %v3022_v42 = vrot.slane %v1982_v55, %v3301_v29 }
 0x8f4   : > { %v1221_v43 = vrot.slane %v1211_v51, %v3299_v57  ;;  %v3025_v51 = vrot.slane %v1982_v55, %v3302_v18 }
 0x8f6   : > { %v1222_v63 = vsel %vm271_vm1, %v1221_v43, %v1217_v36  ;;  %v1974_v36 = vld [vmem:[%s1502_s9 + $0x640] ss:$8 sm:$0xf] }
 0x8f7   : > { %v1224_v56 = vadd.f32 %v1222_v63, %v2878_v35  ;;  %v1976_v43 = vld [vmem:[%s1502_s9 + $0xc80] ss:$8 sm:$0xf]  ;;  %v3028_v63 = vrot.slane %v1503_v13, %v3296_v32 }
 0x8f8   : > { %v3068_v16 = vrot.slane %v1976_v43, %v3296_v32  ;;  %v3071_v2 = vrot.slane %v1976_v43, %v3297_v3  ;;  %v3074_v48 = vrot.slane %v1976_v43, %v3301_v29  ;;  %v3077_v52 = vrot.slane %v1976_v43, %v3302_v18 }
 0x8f9   : > { %v1225_v61 = vsub.f32 %v1224_v56, %v1224_v56  ;;  %v3031_v56 = vrot.slane %v1503_v13, %v3297_v3 }
 0x8fa   : > { %3303 = vst [vmem:[#allocation32_spill] sm:$0xff] %v3068_v16  ;;  %3304 = vst [vmem:[#allocation33_spill] sm:$0xff] %v3071_v2 }
 0x8fb   : > { %v1226_v4 = vmul.f32 %v1225_v61, %v1225_v61  ;;  %3305 = vst [vmem:[#allocation34_spill] sm:$0xff] %v3074_v48  ;;  %3306 = vst [vmem:[#allocation35_spill] sm:$0xff] %v3077_v52 }
 0x8fd   : > { %v1227_v44 = vadd.f32 1e-05, %v1226_v4  ;;  %v3037_v4 = vrot.slane %v1503_v13, %v3302_v18 }
 0x8ff   : > { %2137 = vrsqrt.f32 %v1227_v44  ;;  %v3040_v44 = vrot.slane %v1970_v37, %v3296_v32 }
 0x909   : > { %v2138_v62 = vpop.eup %2137 }
 0x90a   : > { %v1229_v8 = vmul.f32 %v2138_v62, %v1225_v61  ;;  %v3034_v61 = vrot.slane %v1503_v13, %v3301_v29  ;;  %v3043_v62 = vrot.slane %v1970_v37, %v3297_v3 }
 0x90c   : > { %v1231_v38 = vmul.f32 %v1230_v5, %v1229_v8  ;;  %v3046_v5 = vrot.slane %v1970_v37, %v3301_v29  ;;  %v3049_v8 = vrot.slane %v1970_v37, %v3302_v18 }
 0x90e   : > { %v2921_v39 = vadd.f32 %v1232_v7, %v1231_v38  ;;  %v3052_v7 = vrot.slane %v1974_v36, %v3296_v32  ;;  %v3055_v38 = vrot.slane %v1974_v36, %v3297_v3 }
 0x910   : > { %3300 = vst [vmem:[#allocation31_spill] sm:$0xff] %v2921_v39  ;;  %v1244_v35 = vrot.slane %v2921_v39, %v3297_v3  ;;  %v1237_v40 = vrot.slane %v2921_v39, %v3296_v32 }
 0x912   : > { %1246 = vbcast.lane.b32.xlu1 %v1244_v35, 256  ;;  %1239 = vbcast.lane.b32.xlu0 %v1237_v40, 256  ;;  %v3058_v35 = vrot.slane %v1974_v36, %v3301_v29  ;;  %v3061_v40 = vrot.slane %v1974_v36, %v3302_v18 }
 0x984   : > { %v3063_v15 = vpop.permute.xlu1 %1246  ;;  %v3065_v41 = vpop.permute.xlu0 %1239 }
 0x985   : > { %v1289_v50 = vmul.f32 %v2931_v17, %v3063_v15  ;;  %v1290_v55 = vmul.f32 %v2934_v45, %v3063_v15  ;;  %v1291_v13 = vmul.f32 %v2937_v46, %v3063_v15  ;;  %v1292_v37 = vmul.f32 %v2940_v19, %v3063_v15 }
 0x986   : > { %v1285_v36 = vmul.f32 %v2931_v17, %v3065_v41  ;;  %v1286_v3 = vmul.f32 %v2934_v45, %v3065_v41  ;;  %v1287_v43 = vmul.f32 %v2937_v46, %v3065_v41  ;;  %v1288_v14 = vmul.f32 %v2940_v19, %v3065_v41 }
 0x987   : > { %v1318_v18 = vadd.f32 %v2943_v6, %v1289_v50  ;;  %v1319_v29 = vadd.f32 %v2946_v9, %v1290_v55  ;;  %v1320_v31 = vadd.f32 %v2949_v0, %v1291_v13  ;;  %v1321_v32 = vadd.f32 %v2952_v47, %v1292_v37 }
 0x988   : > { %v1314_v39 = vadd.f32 %v2943_v6, %v1285_v36  ;;  %v1315_v17 = vadd.f32 %v2946_v9, %v1286_v3  ;;  %v1316_v45 = vadd.f32 %v2949_v0, %v1287_v43  ;;  %v1317_v57 = vadd.f32 %v2952_v47, %v1288_v14 }
 0x989   : > { %v1326_v46 = vmax.f32 %v1318_v18, 0.0  ;;  %v1327_v52 = vmax.f32 %v1319_v29, 0.0  ;;  %v1328_v48 = vmax.f32 %v1320_v31, 0.0  ;;  %v1329_v19 = vmax.f32 %v1321_v32, 0.0 }
 0x98a   : > { %v1322_v2 = vmax.f32 %v1314_v39, 0.0  ;;  %v1323_v50 = vmax.f32 %v1315_v17, 0.0  ;;  %v1324_v16 = vmax.f32 %v1316_v45, 0.0  ;;  %v1325_v55 = vmax.f32 %v1317_v57, 0.0 }
 0x98b   : > { %v1355_v13 = vmul.f32 %v2967_v21, %v1326_v46  ;;  %v1356_v37 = vmul.f32 %v2970_v22, %v1327_v52  ;;  %v1357_v6 = vmul.f32 %v2973_v49, %v1328_v48  ;;  %v1358_v3 = vmul.f32 %v2976_v23, %v1329_v19 }
 0x98c   : > { %v1351_v9 = vmul.f32 %v2967_v21, %v1322_v2  ;;  %v1352_v14 = vmul.f32 %v2970_v22, %v1323_v50  ;;  %v1353_v29 = vmul.f32 %v2973_v49, %v1324_v16  ;;  %v1354_v31 = vmul.f32 %v2976_v23, %v1325_v55 }
 0x98d   : > { %v1364_v32 = vadd.f32 %v1356_v37, %v1355_v13  ;;  %v1658_v57 = vmul.f32 %v2955_v53, %v3063_v15  ;;  %v1659_v39 = vmul.f32 %v2958_v20, %v3063_v15  ;;  %v1660_v18 = vmul.f32 %v2961_v54, %v3063_v15 }
 0x98e   : > { %v1359_v0 = vadd.f32 %v1352_v14, %v1351_v9  ;;  %v1661_v47 = vmul.f32 %v2964_v30, %v3063_v15  ;;  %v1408_v21 = vmul.f32 %v2979_v10, %v3065_v41  ;;  %v1409_v22 = vmul.f32 %v2982_v26, %v3065_v41 }
 0x98f   : > { %v1365_v49 = vadd.f32 %v1364_v32, %v1357_v6  ;;  %v1687_v23 = vadd.f32 %v2991_v12, %v1658_v57  ;;  %v1688_v16 = vadd.f32 %v2994_v58, %v1659_v39  ;;  %v1689_v2 = vadd.f32 %v2997_v25, %v1660_v18 }
 0x990   : > { %v1360_v48 = vadd.f32 %v1359_v0, %v1353_v29  ;;  %v1690_v52 = vadd.f32 %v3000_v59, %v1661_v47  ;;  %v1410_v36 = vmul.f32 %v2985_v28, %v3065_v41  ;;  %v1411_v43 = vmul.f32 %v2988_v11, %v3065_v41 }
 0x991   : > { %v1366_v17 = vadd.f32 %v1365_v49, %v1358_v3  ;;  %v1695_v45 = vmax.f32 %v1687_v23, 0.0  ;;  %v1696_v46 = vmax.f32 %v1688_v16, 0.0  ;;  %v1697_v19 = vmax.f32 %v1689_v2, 0.0 }
 0x992   : > { %v1361_v50 = vadd.f32 %v1360_v48, %v1354_v31  ;;  %v1698_v55 = vmax.f32 %v1690_v52, 0.0  ;;  %v1437_v13 = vadd.f32 %v3004_v33, %v1408_v21  ;;  %v1438_v37 = vadd.f32 %v3007_v34, %v1409_v22 }
 0x993   : > { %1367 = vadd.xlane.f32.xlu1 %v1366_v17  ;;  %v1724_v6 = vmul.f32 %v3016_v1, %v1695_v45  ;;  %v1725_v9 = vmul.f32 %v3019_v60, %v1696_v46  ;;  %v1726_v14 = vmul.f32 %v3022_v42, %v1697_v19  ;;  %v1439_v29 = vadd.f32 %v3010_v27, %v1410_v36 }
 0x994   : > { %1362 = vadd.xlane.f32.xlu0 %v1361_v50  ;;  %v1727_v3 = vmul.f32 %v3025_v51, %v1698_v55  ;;  %v1440_v32 = vadd.f32 %v3013_v24, %v1411_v43  ;;  %v1445_v31 = vmax.f32 %v1437_v13, 0.0  ;;  %v1446_v57 = vmax.f32 %v1438_v37, 0.0 }
 0x995   : > { %v1733_v39 = vadd.f32 %v1725_v9, %v1724_v6  ;;  %v1447_v18 = vmax.f32 %v1439_v29, 0.0  ;;  %v1412_v0 = vmul.f32 %v2979_v10, %v3063_v15  ;;  %v1413_v47 = vmul.f32 %v2982_v26, %v3063_v15 }
 0x996   : > { %v1448_v21 = vmax.f32 %v1440_v32, 0.0  ;;  %v1474_v22 = vmul.f32 %v3040_v44, %v1445_v31  ;;  %v1475_v49 = vmul.f32 %v3043_v62, %v1446_v57  ;;  %v1414_v23 = vmul.f32 %v2985_v28, %v3063_v15 }
 0x997   : > { %v1734_v16 = vadd.f32 %v1733_v39, %v1726_v14  ;;  %v1476_v2 = vmul.f32 %v3046_v5, %v1447_v18  ;;  %v1415_v48 = vmul.f32 %v2988_v11, %v3063_v15  ;;  %v1441_v52 = vadd.f32 %v3004_v33, %v1412_v0 }
 0x998   : > { %v1477_v10 = vmul.f32 %v3049_v8, %v1448_v21  ;;  %v1482_v36 = vadd.f32 %v1475_v49, %v1474_v22  ;;  %v1442_v26 = vadd.f32 %v3007_v34, %v1413_v47  ;;  %v1443_v43 = vadd.f32 %v3010_v27, %v1414_v23  ;;  %v3307_v47 = vld [vmem:[#allocation32_spill] sm:$0xff]  ;;  %v3308_v23 = vld [vmem:[#allocation33_spill] sm:$0xff] }
 0x999   : > { %v1735_v17 = vadd.f32 %v1734_v16, %v1727_v3  ;;  %v1444_v45 = vadd.f32 %v3013_v24, %v1415_v48  ;;  %v1449_v46 = vmax.f32 %v1441_v52, 0.0  ;;  %v1531_v28 = vmul.f32 %v3028_v63, %v3065_v41  ;;  %v3310_v48 = vld [vmem:[#allocation35_spill] sm:$0xff] }
 0x99a   : > { %v1483_v19 = vadd.f32 %v1482_v36, %v1476_v2  ;;  %v1450_v50 = vmax.f32 %v1442_v26, 0.0  ;;  %v1451_v55 = vmax.f32 %v1443_v43, 0.0  ;;  %v1532_v11 = vmul.f32 %v3031_v56, %v3065_v41 }
 0x99b   : > { %1736 = vadd.xlane.f32.xlu1 %v1735_v17  ;;  %v1452_v33 = vmax.f32 %v1444_v45, 0.0  ;;  %v1478_v13 = vmul.f32 %v3040_v44, %v1449_v46  ;;  %v1533_v34 = vmul.f32 %v3034_v61, %v3065_v41  ;;  %v1534_v27 = vmul.f32 %v3037_v4, %v3065_v41 }
 0x99c   : > { %v1484_v24 = vadd.f32 %v1483_v19, %v1477_v10  ;;  %v1479_v37 = vmul.f32 %v3043_v62, %v1450_v50  ;;  %v1480_v6 = vmul.f32 %v3046_v5, %v1451_v55  ;;  %v1560_v9 = vadd.f32 %v3052_v7, %v1531_v28 }
 0x99d   : > { %v1481_v14 = vmul.f32 %v3049_v8, %v1452_v33  ;;  %v1561_v29 = vadd.f32 %v3055_v38, %v1532_v11  ;;  %v1562_v3 = vadd.f32 %v3058_v35, %v1533_v34  ;;  %v1563_v44 = vadd.f32 %v3061_v40, %v1534_v27 }
 0x99e   : > { %1485 = vadd.xlane.f32.xlu0 %v1484_v24  ;;  %v1487_v32 = vadd.f32 %v1479_v37, %v1478_v13  ;;  %v1568_v31 = vmax.f32 %v1560_v9, 0.0  ;;  %v1535_v57 = vmul.f32 %v3028_v63, %v3063_v15  ;;  %v1536_v62 = vmul.f32 %v3031_v56, %v3063_v15  ;;  %v3309_v63 = vld [vmem:[#allocation34_spill] sm:$0xff] }
 0x99f   : > { %v1569_v5 = vmax.f32 %v1561_v29, 0.0  ;;  %v1570_v39 = vmax.f32 %v1562_v3, 0.0  ;;  %v1571_v18 = vmax.f32 %v1563_v44, 0.0  ;;  %v1537_v8 = vmul.f32 %v3034_v61, %v3063_v15 }
 0x9a0   : > { %v1488_v0 = vadd.f32 %v1487_v32, %v1480_v6  ;;  %v1597_v21 = vmul.f32 %v3307_v47, %v1568_v31  ;;  %v1538_v22 = vmul.f32 %v3037_v4, %v3063_v15  ;;  %v1564_v49 = vadd.f32 %v3052_v7, %v1535_v57 }
 0x9a1   : > { %v1598_v16 = vmul.f32 %v3308_v23, %v1569_v5  ;;  %v1599_v2 = vmul.f32 %v3309_v63, %v1570_v39  ;;  %v1600_v56 = vmul.f32 %v3310_v48, %v1571_v18  ;;  %v1565_v52 = vadd.f32 %v3055_v38, %v1536_v62 }
 0x9a2   : > { %v1489_v10 = vadd.f32 %v1488_v0, %v1481_v14  ;;  %v1566_v36 = vadd.f32 %v3058_v35, %v1537_v8  ;;  %v1567_v61 = vadd.f32 %v3061_v40, %v1538_v22  ;;  %v1572_v26 = vmax.f32 %v1564_v49, 0.0 }
 0x9a3   : > { %v1605_v43 = vadd.f32 %v1598_v16, %v1597_v21  ;;  %v1573_v17 = vmax.f32 %v1565_v52, 0.0  ;;  %v1654_v4 = vmul.f32 %v2955_v53, %v3065_v41  ;;  %v1655_v7 = vmul.f32 %v2958_v20, %v3065_v41 }
 0x9a4   : > { %1490 = vadd.xlane.f32.xlu0 %v1489_v10  ;;  %v1574_v15 = vmax.f32 %v1566_v36, 0.0  ;;  %v1575_v45 = vmax.f32 %v1567_v61, 0.0  ;;  %v1601_v46 = vmul.f32 %v3307_v47, %v1572_v26  ;;  %v1656_v38 = vmul.f32 %v2961_v54, %v3065_v41  ;;  %v3311_v47 = vld [vmem:[#allocation19_spill] sm:$0xff] }
 0x9a5   : > { %v1606_v35 = vadd.f32 %v1605_v43, %v1599_v2  ;;  %v1602_v40 = vmul.f32 %v3308_v23, %v1573_v17  ;;  %v1657_v28 = vmul.f32 %v2964_v30, %v3065_v41  ;;  %v1683_v19 = vadd.f32 %v2991_v12, %v1654_v4  ;;  %v3312_v23 = vld [vmem:[#allocation31_spill] sm:$0xff] }
 0x9a6   : > { %v1603_v53 = vmul.f32 %v3309_v63, %v1574_v15  ;;  %v1684_v20 = vadd.f32 %v2994_v58, %v1655_v7  ;;  %v1685_v50 = vadd.f32 %v2997_v25, %v1656_v38  ;;  %v1604_v27 = vmul.f32 %v3310_v48, %v1575_v45 }
 0x9a7   : > { %v1607_v55 = vadd.f32 %v1606_v35, %v1600_v56  ;;  %v1610_v11 = vadd.f32 %v1602_v40, %v1601_v46  ;;  %v1686_v33 = vadd.f32 %v3000_v59, %v1657_v28  ;;  %v1691_v13 = vmax.f32 %v1683_v19, 0.0 }
 0x9a8   : > { %v1692_v54 = vmax.f32 %v1684_v20, 0.0  ;;  %v1693_v34 = vmax.f32 %v1685_v50, 0.0  ;;  %v1761_v52 = vstv %s921_s17  ;;  %v1763_v36 = vstv %s925_s18 }
 0x9a9   : > { %1608 = vadd.xlane.f32.xlu0 %v1607_v55  ;;  %v1611_v30 = vadd.f32 %v1610_v11, %v1603_v53  ;;  %v1720_v12 = vmul.f32 %v3016_v1, %v1691_v13  ;;  %v1694_v41 = vmax.f32 %v1686_v33, 0.0  ;;  %v1772_v15 = vstv (%p828_p9), %s1765_s10 }
 0x9aa   : > { %v1721_v58 = vmul.f32 %v3019_v60, %v1692_v54  ;;  %v1722_v25 = vmul.f32 %v3022_v42, %v1693_v34  ;;  %v1774_v46 = vstv (%p828_p9), %s1983_s11  ;;  %v1777_v35 = vstv (%p828_p9), %s1984_s19 }
 0x9ab   : > { %v1612_v24 = vadd.f32 %v1611_v30, %v1604_v27  ;;  %v1723_v59 = vmul.f32 %v3025_v51, %v1694_v41  ;;  %v1740_v51 = vstv %s901_s5  ;;  %v1780_v28 = vstv (%p828_p9), %s1985_s20 }
 0x9ac   : > { %v1728_v37 = vadd.f32 %v1721_v58, %v1720_v12 }
 0x9ad   : > { %1613 = vadd.xlane.f32.xlu0 %v1612_v24 }
 0x9ae   : > { %v1729_v6 = vadd.f32 %v1728_v37, %v1722_v25 }
 0x9b0   : > { %v1730_v9 = vadd.f32 %v1729_v6, %v1723_v59 }
 0x9b2   : > { %1731 = vadd.xlane.f32.xlu0 %v1730_v9 }
 0xa20   : > { %v1368_v1 = vpop.xlane.xlu1 %1367 }
 0xa21   : > { %v1363_v14 = vpop.xlane.xlu0 %1362 }
 0xa28   : > { %v1737_v42 = vpop.xlane.xlu1 %1736 }
 0xa2b   : > { %v1486_v29 = vpop.xlane.xlu0 %1485 }
 0xa2c   : > { %v1492_v57 = vadd.f32 %v1486_v29, %v1363_v14 }
 0xa31   : > { %v1491_v3 = vpop.xlane.xlu0 %1490 }
 0xa32   : > { %v1493_v32 = vadd.f32 %v1491_v3, %v1368_v1 }
 0xa36   : > { %v1609_v44 = vpop.xlane.xlu0 %1608 }
 0xa37   : > { %v1615_v5 = vadd.f32 %v1609_v44, %v1492_v57 }
 0xa3a   : > { %v1614_v60 = vpop.xlane.xlu0 %1613 }
 0xa3b   : > { %v1616_v31 = vadd.f32 %v1614_v60, %v1493_v32 }
 0xa3d   : > { %v1739_v62 = vadd.f32 %v1737_v42, %v1616_v31 }
 0xa3f   : > { %v1732_v39 = vpop.xlane.xlu0 %1731  ;;  %v1742_v18 = vadd.f32 %v1740_v51, %v1739_v62 }
 0xa40   : > { %v1738_v8 = vadd.f32 %v1732_v39, %v1615_v5 }
 0xa41   : > { %v1752_v21 = vrot.slane %v1742_v18, %v3311_v47 }
 0xa42   : > { %v1741_v0 = vadd.f32 %v1740_v51, %v1738_v8 }
 0xa44   : > { %v1748_v22 = vrot.slane %v1741_v0, %v3311_v47 }
 0xa46   : > { %v1753_v49 = vsel %vm271_vm1, %v1752_v21, %v1748_v22 }
 0xa47   : > { %v1755_v16 = vadd.f32 %v1753_v49, %v3312_v23 }
 0xa49   : > { %v1756_v63 = vsub.f32 %v1755_v16, %v1755_v16 }
 0xa4b   : > { %v1757_v2 = vmul.f32 %v1756_v63, %v1756_v63 }
 0xa4d   : > { %v1758_v48 = vadd.f32 1e-05, %v1757_v2 }
 0xa4f   : > { %2139 = vrsqrt.f32 %v1758_v48 }
 0xa59   : > { %v2140_v56 = vpop.eup %2139 }
 0xa5a   : > { %v1760_v10 = vmul.f32 %v2140_v56, %v1756_v63  ;;  %830 = sbr.rel (!%p828_p9) target bundleno = 1075 (0x433), region = 93 }
 0xa5c   : > { %v1762_v61 = vmul.f32 %v1761_v52, %v1760_v10 }
 0xa5e   : > { %v1764_v26 = vadd.f32 %v1763_v36, %v1762_v61  }
 0xa60   : > { %v3313_v27 = vmov %v1764_v26  ;;  %v1767_v43 = vsub.f32 (%p828_p9), %v1764_v26, %v1764_v26 }
 0xa62   :  { %v1768_v17 = vmul.f32 %v1767_v43, %v1767_v43 }
 0xa64   :  { %v1769_v4 = vadd.f32 1e-05, %v1768_v17 }
 0xa66   :  { %2141 = vrsqrt.f32 %v1769_v4 }
 0xa70   :  { %v2142_v7 = vpop.eup %2141 }
 0xa71   :  { %v1771_v45 = vmul.f32 %v2142_v7, %v1767_v43 }
 0xa73   :  { %v1773_v38 = vmul.f32 %v1772_v15, %v1771_v45 }
 0xa75   :  { %v1775_v40 = vadd.f32 %v1774_v46, %v1773_v38 }
 0xa77   :  { %v1778_v19 = vmul.f32 %v1777_v35, %v1775_v40 }
 0xa79   :  { %v1781_v53 = vadd.f32 %v1780_v28, %v1778_v19 }
 0xa7b   :  { %1783 = vrot.lane.b32.xlu0 %v1781_v53, %s2297_s8 }
 0xaed   :  { %v1784_v20 = vpop.permute.xlu0 %1783 }
 0xaee   :  { %1787 = vst.msk [vmem:[%s3229_s7] sm:$0x3] %vm1786_vm2, %v1784_v20 }
 0xaef   :  { %1792 = vsyncpa [#allocation8], 1 }
 0xaf0   :  { %1793 = vsyncpa [#allocation10], 1 }

</bundles_post_ra>
